<compile_context>
chip_gen: v7x
topology: tpu7x:2x2x1
jax: 0.10.0
libtpu: 0.0.40
codegen_flags: <defaults>
</compile_context>

<pallas_src>
import functools

import jax
import jax.numpy as jnp
from jax.experimental import pallas as pl


def _round_up(x, m):
    return ((x + m - 1) // m) * m


def _pad2d(a, rows, cols):
    return jnp.pad(a, ((0, rows - a.shape[0]), (0, cols - a.shape[1])))


def _full_spec(shape):
    # Whole-array block resident in VMEM; grid = (), so index_map takes no args.
    return pl.BlockSpec(shape, lambda: tuple(0 for _ in shape))


# ---------------------------------------------------------------------------
# Fused kernel: 5x GraphConv (+relu) -> mean pool -> Linear, all in VMEM.
# ---------------------------------------------------------------------------
def fused_gnn_kernel(a_ref, x_ref, ws_ref, bs_ref, p_ref, wl_ref, bl_ref, o_ref,
                     *, num_layers):
    a = a_ref[...]           # adjacency loaded once, resident across all layers
    h = x_ref[...]           # activation stays resident; never goes back to HBM
    for li in range(num_layers):            # static unrolled layer loop
        agg = jnp.dot(a, h, preferred_element_type=jnp.float32)
        # One MXU matmul with K = 2*D instead of two K = D matmuls.
        cat = jnp.concatenate([agg, h], axis=1)
        h = jnp.dot(cat, ws_ref[li], preferred_element_type=jnp.float32) + bs_ref[li]
        if li < num_layers - 1:              # relu after conv1..conv4, NOT conv5
            h = jnp.maximum(h, 0.0)
    # Epilogue fused in the same kernel: pool (matmul with P) + final Linear.
    # TODO(synk): dropout(p=0.5) is identity in eval mode; training-mode RNG
    # masking is not implemented.
    pooled = jnp.dot(p_ref[...], h, preferred_element_type=jnp.float32)
    o_ref[...] = (
        jnp.dot(pooled, wl_ref[...], preferred_element_type=jnp.float32)
        + bl_ref[...]
    )


# ---------------------------------------------------------------------------
# Wrapper: pad to lane-dense shapes, stack per-layer weights, single pallas_call.
# ---------------------------------------------------------------------------
def gnn_forward(x, adj, pool_mat, params):
    n, f = x.shape
    g = pool_mat.shape[0]
    h_dim = params["convs"][0][0].shape[1]
    c = params["w_lin"].shape[1]
    num_layers = len(params["convs"])

    d = _round_up(max(f, h_dim), 128)   # unified, lane-dense feature width
    n_pad = _round_up(n, 128)           # node dim (MXU / lane friendly)
    g_pad = _round_up(g, 8)             # graph dim (sublane friendly)
    c_pad = _round_up(c, 128)           # class dim (lane friendly)

    a_p = _pad2d(adj.astype(jnp.float32), n_pad, n_pad)
    x_p = _pad2d(x.astype(jnp.float32), n_pad, d)
    p_p = _pad2d(pool_mat.astype(jnp.float32), g_pad, n_pad)

    # Stack [W_rel ; W_root] per layer -> (L, 2D, D); biases -> (L, 1, D).
    ws, bs = [], []
    for (w_rel, w_root, b) in params["convs"]:
        ws.append(jnp.concatenate([_pad2d(w_rel, d, d), _pad2d(w_root, d, d)],
                                  axis=0))
        bs.append(_pad2d(b.reshape(1, -1), 1, d))
    w_stack = jnp.stack(ws, axis=0)     # (L, 2D, D)
    b_stack = jnp.stack(bs, axis=0)     # (L, 1, D)

    wl_p = _pad2d(params["w_lin"], d, c_pad)
    bl_p = _pad2d(params["b_lin"].reshape(1, -1), 1, c_pad)

    kernel = functools.partial(fused_gnn_kernel, num_layers=num_layers)
    out_p = pl.pallas_call(
        kernel,
        out_shape=jax.ShapeDtypeStruct((g_pad, c_pad), jnp.float32),
        in_specs=[
            _full_spec(a_p.shape),
            _full_spec(x_p.shape),
            _full_spec(w_stack.shape),
            _full_spec(b_stack.shape),
            _full_spec(p_p.shape),
            _full_spec(wl_p.shape),
            _full_spec(bl_p.shape),
        ],
        out_specs=_full_spec((g_pad, c_pad)),
    )(a_p, x_p, w_stack, b_stack, p_p, wl_p, bl_p)
    return out_p[:g, :c]


def init_params(key, num_node_features, hidden_channels, num_classes):
    dims = [num_node_features] + [hidden_channels] * 5
    convs = []
    for i in range(5):
        key, k1, k2, k3 = jax.random.split(key, 4)
        fan_in, fan_out = dims[i], dims[i + 1]
        scale = 1.0 / jnp.sqrt(fan_in)
        w_rel = jax.random.uniform(k1, (fan_in, fan_out), jnp.float32, -scale, scale)
        w_root = jax.random.uniform(k2, (fan_in, fan_out), jnp.float32, -scale, scale)
        b = jax.random.uniform(k3, (1, fan_out), jnp.float32, -scale, scale)
        convs.append((w_rel, w_root, b))
    key, k1, k2 = jax.random.split(key, 3)
    scale = 1.0 / jnp.sqrt(hidden_channels)
    w_lin = jax.random.uniform(
        k1, (hidden_channels, num_classes), jnp.float32, -scale, scale
    )
    b_lin = jax.random.uniform(k2, (1, num_classes), jnp.float32, -scale, scale)
    return {"convs": convs, "w_lin": w_lin, "b_lin": b_lin}


if __name__ == "__main__":
    key = jax.random.PRNGKey(0)

    NUM_NODES = 16
    NUM_FEATURES = 4
    HIDDEN = 32
    NUM_CLASSES = 3
    NUM_GRAPHS = 2
    NUM_EDGES = 40

    # Node features.
    key, kx = jax.random.split(key)
    x = jax.random.normal(kx, (NUM_NODES, NUM_FEATURES), jnp.float32)

    # Random edge_index (2, E): row 0 = source, row 1 = target.
    key, ks, kt = jax.random.split(key, 3)
    src = jax.random.randint(ks, (NUM_EDGES,), 0, NUM_NODES)
    dst = jax.random.randint(kt, (NUM_EDGES,), 0, NUM_NODES)

    # Dense adjacency: A[dst, src] += 1 (sum aggregation, multi-edges counted).
    adj = jnp.zeros((NUM_NODES, NUM_NODES), jnp.float32).at[dst, src].add(1.0)

    # Batch vector: nodes 0..7 -> graph 0, nodes 8..15 -> graph 1.
    batch = jnp.concatenate([jnp.zeros(8, jnp.int32), jnp.ones(8, jnp.int32)])
    counts = jax.ops.segment_sum(
        jnp.ones((NUM_NODES,), jnp.float32), batch, num_segments=NUM_GRAPHS
    )
    pool_mat = (
        jnp.zeros((NUM_GRAPHS, NUM_NODES), jnp.float32)
        .at[batch, jnp.arange(NUM_NODES)]
        .set(1.0 / counts[batch])
    )

    key, kp = jax.random.split(key)
    params = init_params(kp, NUM_FEATURES, HIDDEN, NUM_CLASSES)

    out = gnn_forward(x, adj, pool_mat, params)
    out = jax.block_until_ready(out)

    # Pure-JAX reference check (unpadded math).
    h = x
    for li, (w_rel, w_root, b) in enumerate(params["convs"]):
        h = adj @ h @ w_rel + h @ w_root + b
        if li < 4:
            h = jnp.maximum(h, 0.0)
    ref = pool_mat @ h @ params["w_lin"] + params["b_lin"]
    assert out.shape == (NUM_GRAPHS, NUM_CLASSES)
    assert jnp.allclose(out, ref, atol=1e-4, rtol=1e-4)

    print("KERNEL_OK")
</pallas_src>

<mosaic_0001>
module attributes {stable_mosaic.version = 11 : i64} {
  func.func @fused_gnn_kernel(%arg0: memref<128x128xf32, #tpu.memory_space<vmem>>, %arg1: memref<128x128xf32, #tpu.memory_space<vmem>>, %arg2: memref<5x256x128xf32, #tpu.memory_space<vmem>>, %arg3: memref<5x1x128xf32, #tpu.memory_space<vmem>>, %arg4: memref<8x128xf32, #tpu.memory_space<vmem>>, %arg5: memref<128x128xf32, #tpu.memory_space<vmem>>, %arg6: memref<1x128xf32, #tpu.memory_space<vmem>>, %arg7: memref<8x128xf32, #tpu.memory_space<vmem>>) attributes {dimension_semantics = [], scalar_prefetch = 0 : i64, scratch_operands = 0 : i64, tpu.core_type = #tpu.core_type<tc>} {
    %c0 = arith.constant 0 : index
    %c0_0 = arith.constant 0 : index
    %0 = vector.load %arg0[%c0, %c0_0] : memref<128x128xf32, #tpu.memory_space<vmem>>, vector<128x128xf32>
    %c0_1 = arith.constant 0 : index
    %c0_2 = arith.constant 0 : index
    %1 = vector.load %arg1[%c0_1, %c0_2] : memref<128x128xf32, #tpu.memory_space<vmem>>, vector<128x128xf32>
    %cst = arith.constant dense<0.000000e+00> : vector<128x128xf32>
    %2 = tpu.matmul %0, %1, %cst {dimension_numbers = #tpu.dot_dimension_numbers<[1], [0], [0], [1], [0, 0, 1, 1], [], []>} : vector<128x128xf32>, vector<128x128xf32>, vector<128x128xf32> -> vector<128x128xf32>
    %3 = tpu.concatenate %2, %1 in 1 : vector<128x128xf32>, vector<128x128xf32> -> vector<128x256xf32>
    %c0_3 = arith.constant 0 : index
    %c0_4 = arith.constant 0 : index
    %c0_5 = arith.constant 0 : index
    %4 = vector.load %arg2[%c0_3, %c0_4, %c0_5] : memref<5x256x128xf32, #tpu.memory_space<vmem>>, vector<1x256x128xf32>
    %5 = vector.shape_cast %4 : vector<1x256x128xf32> to vector<256x128xf32>
    %cst_6 = arith.constant dense<0.000000e+00> : vector<128x128xf32>
    %6 = tpu.matmul %3, %5, %cst_6 {dimension_numbers = #tpu.dot_dimension_numbers<[1], [0], [0], [1], [0, 0, 1, 1], [], []>} : vector<128x256xf32>, vector<256x128xf32>, vector<128x128xf32> -> vector<128x128xf32>
    %c0_7 = arith.constant 0 : index
    %c0_8 = arith.constant 0 : index
    %c0_9 = arith.constant 0 : index
    %7 = vector.load %arg3[%c0_7, %c0_8, %c0_9] : memref<5x1x128xf32, #tpu.memory_space<vmem>>, vector<1x1x128xf32>
    %8 = vector.shape_cast %7 : vector<1x1x128xf32> to vector<1x128xf32>
    %9 = vector.broadcast %8 : vector<1x128xf32> to vector<128x128xf32>
    %10 = arith.addf %6, %9 : vector<128x128xf32>
    %cst_10 = arith.constant 0.000000e+00 : f32
    %11 = vector.broadcast %cst_10 : f32 to vector<128x128xf32>
    %12 = arith.maximumf %10, %11 : vector<128x128xf32>
    %cst_11 = arith.constant dense<0.000000e+00> : vector<128x128xf32>
    %13 = tpu.matmul %0, %12, %cst_11 {dimension_numbers = #tpu.dot_dimension_numbers<[1], [0], [0], [1], [0, 0, 1, 1], [], []>} : vector<128x128xf32>, vector<128x128xf32>, vector<128x128xf32> -> vector<128x128xf32>
    %14 = tpu.concatenate %13, %12 in 1 : vector<128x128xf32>, vector<128x128xf32> -> vector<128x256xf32>
    %c1 = arith.constant 1 : index
    %c0_12 = arith.constant 0 : index
    %c0_13 = arith.constant 0 : index
    %15 = vector.load %arg2[%c1, %c0_12, %c0_13] : memref<5x256x128xf32, #tpu.memory_space<vmem>>, vector<1x256x128xf32>
    %16 = vector.shape_cast %15 : vector<1x256x128xf32> to vector<256x128xf32>
    %cst_14 = arith.constant dense<0.000000e+00> : vector<128x128xf32>
    %17 = tpu.matmul %14, %16, %cst_14 {dimension_numbers = #tpu.dot_dimension_numbers<[1], [0], [0], [1], [0, 0, 1, 1], [], []>} : vector<128x256xf32>, vector<256x128xf32>, vector<128x128xf32> -> vector<128x128xf32>
    %c1_15 = arith.constant 1 : index
    %c0_16 = arith.constant 0 : index
    %c0_17 = arith.constant 0 : index
    %18 = vector.load %arg3[%c1_15, %c0_16, %c0_17] : memref<5x1x128xf32, #tpu.memory_space<vmem>>, vector<1x1x128xf32>
    %19 = vector.shape_cast %18 : vector<1x1x128xf32> to vector<1x128xf32>
    %20 = vector.broadcast %19 : vector<1x128xf32> to vector<128x128xf32>
    %21 = arith.addf %17, %20 : vector<128x128xf32>
    %cst_18 = arith.constant 0.000000e+00 : f32
    %22 = vector.broadcast %cst_18 : f32 to vector<128x128xf32>
    %23 = arith.maximumf %21, %22 : vector<128x128xf32>
    %cst_19 = arith.constant dense<0.000000e+00> : vector<128x128xf32>
    %24 = tpu.matmul %0, %23, %cst_19 {dimension_numbers = #tpu.dot_dimension_numbers<[1], [0], [0], [1], [0, 0, 1, 1], [], []>} : vector<128x128xf32>, vector<128x128xf32>, vector<128x128xf32> -> vector<128x128xf32>
    %25 = tpu.concatenate %24, %23 in 1 : vector<128x128xf32>, vector<128x128xf32> -> vector<128x256xf32>
    %c2 = arith.constant 2 : index
    %c0_20 = arith.constant 0 : index
    %c0_21 = arith.constant 0 : index
    %26 = vector.load %arg2[%c2, %c0_20, %c0_21] : memref<5x256x128xf32, #tpu.memory_space<vmem>>, vector<1x256x128xf32>
    %27 = vector.shape_cast %26 : vector<1x256x128xf32> to vector<256x128xf32>
    %cst_22 = arith.constant dense<0.000000e+00> : vector<128x128xf32>
    %28 = tpu.matmul %25, %27, %cst_22 {dimension_numbers = #tpu.dot_dimension_numbers<[1], [0], [0], [1], [0, 0, 1, 1], [], []>} : vector<128x256xf32>, vector<256x128xf32>, vector<128x128xf32> -> vector<128x128xf32>
    %c2_23 = arith.constant 2 : index
    %c0_24 = arith.constant 0 : index
    %c0_25 = arith.constant 0 : index
    %29 = vector.load %arg3[%c2_23, %c0_24, %c0_25] : memref<5x1x128xf32, #tpu.memory_space<vmem>>, vector<1x1x128xf32>
    %30 = vector.shape_cast %29 : vector<1x1x128xf32> to vector<1x128xf32>
    %31 = vector.broadcast %30 : vector<1x128xf32> to vector<128x128xf32>
    %32 = arith.addf %28, %31 : vector<128x128xf32>
    %cst_26 = arith.constant 0.000000e+00 : f32
    %33 = vector.broadcast %cst_26 : f32 to vector<128x128xf32>
    %34 = arith.maximumf %32, %33 : vector<128x128xf32>
    %cst_27 = arith.constant dense<0.000000e+00> : vector<128x128xf32>
    %35 = tpu.matmul %0, %34, %cst_27 {dimension_numbers = #tpu.dot_dimension_numbers<[1], [0], [0], [1], [0, 0, 1, 1], [], []>} : vector<128x128xf32>, vector<128x128xf32>, vector<128x128xf32> -> vector<128x128xf32>
    %36 = tpu.concatenate %35, %34 in 1 : vector<128x128xf32>, vector<128x128xf32> -> vector<128x256xf32>
    %c3 = arith.constant 3 : index
    %c0_28 = arith.constant 0 : index
    %c0_29 = arith.constant 0 : index
    %37 = vector.load %arg2[%c3, %c0_28, %c0_29] : memref<5x256x128xf32, #tpu.memory_space<vmem>>, vector<1x256x128xf32>
    %38 = vector.shape_cast %37 : vector<1x256x128xf32> to vector<256x128xf32>
    %cst_30 = arith.constant dense<0.000000e+00> : vector<128x128xf32>
    %39 = tpu.matmul %36, %38, %cst_30 {dimension_numbers = #tpu.dot_dimension_numbers<[1], [0], [0], [1], [0, 0, 1, 1], [], []>} : vector<128x256xf32>, vector<256x128xf32>, vector<128x128xf32> -> vector<128x128xf32>
    %c3_31 = arith.constant 3 : index
    %c0_32 = arith.constant 0 : index
    %c0_33 = arith.constant 0 : index
    %40 = vector.load %arg3[%c3_31, %c0_32, %c0_33] : memref<5x1x128xf32, #tpu.memory_space<vmem>>, vector<1x1x128xf32>
    %41 = vector.shape_cast %40 : vector<1x1x128xf32> to vector<1x128xf32>
    %42 = vector.broadcast %41 : vector<1x128xf32> to vector<128x128xf32>
    %43 = arith.addf %39, %42 : vector<128x128xf32>
    %cst_34 = arith.constant 0.000000e+00 : f32
    %44 = vector.broadcast %cst_34 : f32 to vector<128x128xf32>
    %45 = arith.maximumf %43, %44 : vector<128x128xf32>
    %cst_35 = arith.constant dense<0.000000e+00> : vector<128x128xf32>
    %46 = tpu.matmul %0, %45, %cst_35 {dimension_numbers = #tpu.dot_dimension_numbers<[1], [0], [0], [1], [0, 0, 1, 1], [], []>} : vector<128x128xf32>, vector<128x128xf32>, vector<128x128xf32> -> vector<128x128xf32>
    %47 = tpu.concatenate %46, %45 in 1 : vector<128x128xf32>, vector<128x128xf32> -> vector<128x256xf32>
    %c4 = arith.constant 4 : index
    %c0_36 = arith.constant 0 : index
    %c0_37 = arith.constant 0 : index
    %48 = vector.load %arg2[%c4, %c0_36, %c0_37] : memref<5x256x128xf32, #tpu.memory_space<vmem>>, vector<1x256x128xf32>
    %49 = vector.shape_cast %48 : vector<1x256x128xf32> to vector<256x128xf32>
    %cst_38 = arith.constant dense<0.000000e+00> : vector<128x128xf32>
    %50 = tpu.matmul %47, %49, %cst_38 {dimension_numbers = #tpu.dot_dimension_numbers<[1], [0], [0], [1], [0, 0, 1, 1], [], []>} : vector<128x256xf32>, vector<256x128xf32>, vector<128x128xf32> -> vector<128x128xf32>
    %c4_39 = arith.constant 4 : index
    %c0_40 = arith.constant 0 : index
    %c0_41 = arith.constant 0 : index
    %51 = vector.load %arg3[%c4_39, %c0_40, %c0_41] : memref<5x1x128xf32, #tpu.memory_space<vmem>>, vector<1x1x128xf32>
    %52 = vector.shape_cast %51 : vector<1x1x128xf32> to vector<1x128xf32>
    %53 = vector.broadcast %52 : vector<1x128xf32> to vector<128x128xf32>
    %54 = arith.addf %50, %53 : vector<128x128xf32>
    %c0_42 = arith.constant 0 : index
    %c0_43 = arith.constant 0 : index
    %55 = vector.load %arg4[%c0_42, %c0_43] : memref<8x128xf32, #tpu.memory_space<vmem>>, vector<8x128xf32>
    %cst_44 = arith.constant dense<0.000000e+00> : vector<8x128xf32>
    %56 = tpu.matmul %55, %54, %cst_44 {dimension_numbers = #tpu.dot_dimension_numbers<[1], [0], [0], [1], [0, 0, 1, 1], [], []>} : vector<8x128xf32>, vector<128x128xf32>, vector<8x128xf32> -> vector<8x128xf32>
    %c0_45 = arith.constant 0 : index
    %c0_46 = arith.constant 0 : index
    %57 = vector.load %arg5[%c0_45, %c0_46] : memref<128x128xf32, #tpu.memory_space<vmem>>, vector<128x128xf32>
    %cst_47 = arith.constant dense<0.000000e+00> : vector<8x128xf32>
    %58 = tpu.matmul %56, %57, %cst_47 {dimension_numbers = #tpu.dot_dimension_numbers<[1], [0], [0], [1], [0, 0, 1, 1], [], []>} : vector<8x128xf32>, vector<128x128xf32>, vector<8x128xf32> -> vector<8x128xf32>
    %c0_48 = arith.constant 0 : index
    %c0_49 = arith.constant 0 : index
    %59 = vector.load %arg6[%c0_48, %c0_49] : memref<1x128xf32, #tpu.memory_space<vmem>>, vector<1x128xf32>
    %60 = vector.broadcast %59 : vector<1x128xf32> to vector<8x128xf32>
    %61 = arith.addf %58, %60 : vector<8x128xf32>
    %c0_50 = arith.constant 0 : index
    %c0_51 = arith.constant 0 : index
    %62 = vector.load %arg7[%c0_50, %c0_51] : memref<8x128xf32, #tpu.memory_space<vmem>>, vector<8x128xf32>
    tpu.vector_store %arg7[%c0_50, %c0_51], %61 {strides = array<i32>} : memref<8x128xf32, #tpu.memory_space<vmem>>, vector<8x128xf32>,
    return
  }
}

</mosaic_0001>

<bundles_post_ra>
// kernel: tpu_custom_call.1
= control target key start
LH: loop header
LB: loop body
LE: loop exit
PB: predicated region body
PF: predicated region fallthrough
CT: control target
= control target key end

     0   :  { %12 = vsyncpa [#allocation3], 0  ;;  %s4395_s0 = inlined_call_operand.hbm [shape: f32[128,128], index: 0, kind: input, shape index: {}]   ;;  %s4396_s1 = inlined_call_operand.hbm [shape: f32[128,128], index: 1, kind: input, shape index: {}]   ;;  %s4397_s2 = inlined_call_operand.hbm [shape: f32[5,256,128], index: 2, kind: input, shape index: {}]   ;;  %s4398_s3 = inlined_call_operand.vmem [shape: f32[5,1,128], index: 3, kind: input, shape index: {}]   ;;  %s4399_s4 = inlined_call_operand.vmem [shape: f32[8,128], index: 4, kind: input, shape index: {}]   ;;  %s4400_s5 = inlined_call_operand.hbm [shape: f32[128,128], index: 5, kind: input, shape index: {}]   ;;  %s4401_s6 = inlined_call_operand.vmem [shape: f32[1,128], index: 6, kind: input, shape index: {}]   ;;  %s4402_s7 = inlined_call_operand.hbm [shape: f32[8,128], index: 7, kind: output, shape index: {}]  }
   0x1   :  { %13 = vsyncpa [#allocation6], 0 }
   0x2   :  { %14 = vsyncpa [#allocation9], 0 }
   0x3   :  { %15 = vsyncpa [#allocation4], 0  ;;  %s3479_s24 = smov [#allocation5]   ;;  %s3480_s26 = smov [#allocation2]  }
   0x4   :  { %s33_s25 = sshll.u32 %s3479_s24, 4  ;;  %s21_s27 = sshll.u32 %s3480_s26, 4  ;;  %s34_s25 = int_to_ptr.vmem [resolvable:$true] %s33_s25  ;;  %s3529_s27 = int_to_ptr.vmem [resolvable:$true] %s21_s27 }
   0x5   :  { %s3361_s30 = scalar_lea.hbm %s4396_s1, 2048 }
   0x6   :  { %p3362_p0 = scmp.ne.s32.totalorder %s4396_s1, %s3361_s30  ;;  %p3365_p1 = scmp.lt.u32.totalorder %s3361_s30, %s4396_s1 }
   0x8   :  { %p3367_p2 = pnand %p3365_p1, %p3362_p0 }
   0xa   :  { %3370 = shalt.err (!%p3367_p2)
}
   0xb   :  { %s3371_s12 = scalar_lea.vmem %s34_s25, 2048  ;;  %p3376_p4 = scmp.lt.s32.totalorder %s34_s25, %s34_s25 }
   0xc   :  { %p3372_p3 = scmp.ne.s32.totalorder %s34_s25, %s3371_s12  ;;  %p3377_p5 = scmp.lt.s32.totalorder %s3371_s12, %s3371_s12 }
   0xe   :  { %p3378_p6 = por %p3377_p5, %p3376_p4 }
  0x10   :  { %p3379_p7 = pnand %p3378_p6, %p3372_p3 }
  0x12   :  { %3382 = shalt.err (!%p3379_p7)
}
  0x13   :  { %s3481_s13 = smov 128   ;;  %s3482_s14 = smov 8  }
  0x14   :  { %39 = dma.hbm_to_vmem [thread:$0]  %s4396_s1, 2048, %s34_s25, [#allocation6], %s3481_s13, %s3481_s13, %s3482_s14  }
  0x15   :  { %s3383_s19 = scalar_lea.hbm %s4395_s0, 2048 }
  0x16   :  { %p3384_p8 = scmp.ne.s32.totalorder %s4395_s0, %s3383_s19  ;;  %p3387_p9 = scmp.lt.u32.totalorder %s3383_s19, %s4395_s0 }
  0x18   :  { %p3389_p10 = pnand %p3387_p9, %p3384_p8 }
  0x1a   :  { %3392 = shalt.err (!%p3389_p10)
}
  0x1b   :  { %s3393_s24 = scalar_lea.vmem %s3529_s27, 2048  ;;  %p3398_p12 = scmp.lt.s32.totalorder %s3529_s27, %s3529_s27 }
  0x1c   :  { %p3394_p11 = scmp.ne.s32.totalorder %s3529_s27, %s3393_s24  ;;  %p3399_p13 = scmp.lt.s32.totalorder %s3393_s24, %s3393_s24 }
  0x1e   :  { %p3400_p0 = por %p3399_p13, %p3398_p12 }
  0x20   :  { %p3401_p1 = pnand %p3400_p0, %p3394_p11 }
  0x22   :  { %3404 = shalt.err (!%p3401_p1)
}
  0x23   :  { %27 = dma.hbm_to_vmem [thread:$0]  %s4395_s0, 2048, %s3529_s27, [#allocation3], %s3481_s13, %s3481_s13, %s3482_s14  }
  0x24   :  { %s3483_s26 = smov [#allocation7]   ;;  %s3484_s29 = smov [#allocation8]  }
  0x25   :  { %s45_s28 = sshll.u32 %s3483_s26, 4  ;;  %s61_s30 = sshll.u32 %s3484_s29, 4  ;;  %s46_s28 = int_to_ptr.vmem [resolvable:$true] %s45_s28  ;;  %s3566_s30 = int_to_ptr.vmem [resolvable:$true] %s61_s30 }
  0x26   :  { %s3405_s10 = scalar_lea.hbm %s4397_s2, 20480 }
  0x27   :  { %p3406_p2 = scmp.ne.s32.totalorder %s4397_s2, %s3405_s10  ;;  %p3409_p3 = scmp.lt.u32.totalorder %s3405_s10, %s4397_s2 }
  0x29   :  { %p3411_p4 = pnand %p3409_p3, %p3406_p2 }
  0x2b   :  { %3414 = shalt.err (!%p3411_p4)
}
  0x2c   :  { %s3415_s0 = scalar_lea.vmem %s46_s28, 20480  ;;  %p3420_p6 = scmp.lt.s32.totalorder %s46_s28, %s46_s28 }
  0x2d   :  { %p3416_p5 = scmp.ne.s32.totalorder %s46_s28, %s3415_s0  ;;  %p3421_p7 = scmp.lt.s32.totalorder %s3415_s0, %s3415_s0 }
  0x2f   :  { %p3422_p8 = por %p3421_p7, %p3420_p6 }
  0x31   :  { %p3423_p9 = pnand %p3422_p8, %p3416_p5 }
  0x33   :  { %3426 = shalt.err (!%p3423_p9)
}
  0x34   :  { %51 = dma.hbm_to_vmem [thread:$0]  %s4397_s2, 20480, %s46_s28, [#allocation6], %s3481_s13, %s3481_s13, %s3482_s14  }
  0x35   :  { %s3427_s20 = scalar_lea.hbm %s4400_s5, 2048 }
  0x36   :  { %p3428_p10 = scmp.ne.s32.totalorder %s4400_s5, %s3427_s20  ;;  %p3431_p11 = scmp.lt.u32.totalorder %s3427_s20, %s4400_s5 }
  0x38   :  { %p3433_p12 = pnand %p3431_p11, %p3428_p10 }
  0x3a   :  { %3436 = shalt.err (!%p3433_p12)
}
  0x3b   :  { %s3437_s1 = scalar_lea.vmem %s3566_s30, 2048  ;;  %p3442_p0 = scmp.lt.s32.totalorder %s3566_s30, %s3566_s30 }
  0x3c   :  { %p3438_p13 = scmp.ne.s32.totalorder %s3566_s30, %s3437_s1  ;;  %p3443_p1 = scmp.lt.s32.totalorder %s3437_s1, %s3437_s1 }
  0x3e   :  { %p3444_p2 = por %p3443_p1, %p3442_p0 }
  0x40   :  { %p3445_p3 = pnand %p3444_p2, %p3438_p13 }
  0x42   :  { %3448 = shalt.err (!%p3445_p3)
}
  0x43   :  { %67 = dma.hbm_to_vmem [thread:$0]  %s4400_s5, 2048, %s3566_s30, [#allocation9], %s3481_s13, %s3481_s13, %s3482_s14  }
  0x44   :  { %3471 = dma.done.wait [#allocation3], 2048  }
  0x45   :  { %3472 = vsyncadd [#allocation3], 4294965248 }
  0x46   :  { %3473 = dma.done.wait [#allocation6], 22528  }
  0x47   :  { %3474 = vsyncadd [#allocation6], 4294944768 }
  0x48   :  { %3475 = dma.done.wait [#allocation9], 2048  }
  0x49   :  { %3476 = vsyncadd [#allocation9], 4294965248  ;;  %v98_v0 = vld [vmem:[#allocation5] sm:$0xff]  ;;  %v3603_v1 = vld [vmem:[#allocation5 + $0x8] sm:$0xff]  ;;  %vm3486_vm0 = vmmov 0   ;;  %s3488_s15 = smov [#allocation10]  }
  0x4a   :  { %v3605_v2 = vld [vmem:[#allocation5 + $0x10] sm:$0xff]  ;;  %v2967_v3 = vpack.c.bf16 %v3603_v1, %v98_v0  ;;  %v3608_v4 = vld [vmem:[#allocation5 + $0x18] sm:$0xff]  ;;  %362 = vmatprep.mubr.f32.mxu1 %v98_v0  ;;  %v3612_v6 = vld [vmem:[#allocation5 + $0x20] sm:$0xff]  ;;  %s2002_s16 = sshll.u32 %s3488_s15, 4  ;;  %s2003_s16 = int_to_ptr.vmem [resolvable:$true] %s2002_s16 }
  0x4b   :  { %v2971_v5 = vpack.c.bf16 %v3608_v4, %v3605_v2  ;;  %v3614_v7 = vld [vmem:[#allocation5 + $0x28] sm:$0xff]  ;;  %v3618_v9 = vld [vmem:[#allocation2] sm:$0xff]  ;;  %v3620_v10 = vld [vmem:[#allocation5 + $0x30] sm:$0xff]  ;;  %s3449_s0 = scalar_lea.vmem %s2003_s16, 128  ;;  %p3454_p5 = scmp.lt.s32.totalorder %s2003_s16, %s2003_s16 }
  0x4c   :  { %2968 = vmatprep.subr.bf16.mxu0 %v2967_v3  ;;  %v2975_v8 = vpack.c.bf16 %v3614_v7, %v3612_v6  ;;  %v3622_v11 = vld [vmem:[#allocation5 + $0x38] sm:$0xff]  ;;  %2649 = vmatprep.mubr.f32.mxu0 %v3618_v9  ;;  %v3627_v13 = vld [vmem:[#allocation5 + $0x40] sm:$0xff]  ;;  %v3629_v14 = vld [vmem:[#allocation5 + $0x48] sm:$0xff]  ;;  %p3450_p4 = scmp.ne.s32.totalorder %s2003_s16, %s3449_s0  ;;  %p3455_p6 = scmp.lt.s32.totalorder %s3449_s0, %s3449_s0 }
  0x4d   :  { %2970 = vmatpush3.bf16.msra.mxu0 %v2967_v3  ;;  %v2979_v12 = vpack.c.bf16 %v3622_v11, %v3620_v10  ;;  %v275_v15 = vld [vmem:[#allocation7 + $0x80] sm:$0xff]  ;;  %v276_v16 = vld [vmem:[#allocation7 + $0x88] sm:$0xff]  ;;  %v277_v21 = vld [vmem:[#allocation7 + $0x90] sm:$0xff]  ;;  %v2983_v24 = vpack.c.bf16 %v3629_v14, %v3627_v13 }
  0x4e   :  { %2972 = vmatprep.subr.bf16.mxu0 %v2971_v5  ;;  %v259_v17 = vld [vmem:[#allocation7] sm:$0xff]  ;;  %v260_v18 = vld [vmem:[#allocation7 + $0x8] sm:$0xff]  ;;  %v2999_v19 = vpack.c.bf16 %v276_v16, %v275_v15  ;;  %v278_v22 = vld [vmem:[#allocation7 + $0x98] sm:$0xff]  ;;  %p3456_p7 = por %p3455_p6, %p3454_p5 }
  0x4f   :  { %v3001_v20 = vpack.c.bf16 %v260_v18, %v259_v17  ;;  %v261_v23 = vld [vmem:[#allocation7 + $0x10] sm:$0xff]  ;;  %v3003_v25 = vpack.c.bf16 %v278_v22, %v277_v21  ;;  %v262_v26 = vld [vmem:[#allocation7 + $0x18] sm:$0xff]  ;;  %v279_v27 = vld [vmem:[#allocation7 + $0xa0] sm:$0xff] }
  0x50   :  { %v280_v28 = vld [vmem:[#allocation7 + $0xa8] sm:$0xff]  ;;  %v3633_v29 = vld [vmem:[#allocation5 + $0x50] sm:$0xff]  ;;  %v3635_v30 = vld [vmem:[#allocation5 + $0x58] sm:$0xff]  ;;  %3000 = vmatprep.subr.bf16.mxu1 %v2999_v19  ;;  %v3005_v31 = vpack.c.bf16 %v262_v26, %v261_v23  ;;  %p3457_p8 = pnand %p3456_p7, %p3450_p4 }
  0x51   :  { %2974 = vmatpush3.bf16.msra.mxu0 %v2971_v5  ;;  %3002 = vmatpush3.bf16.msra.mxu1 %v3001_v20  ;;  %v3007_v32 = vpack.c.bf16 %v280_v28, %v279_v27  ;;  %v263_v33 = vld [vmem:[#allocation7 + $0x20] sm:$0xff]  ;;  %v264_v34 = vld [vmem:[#allocation7 + $0x28] sm:$0xff]  ;;  %v2987_v35 = vpack.c.bf16 %v3635_v30, %v3633_v29  ;;  %v281_v36 = vld [vmem:[#allocation7 + $0xb0] sm:$0xff] }
  0x52   :  { %2976 = vmatprep.subr.bf16.mxu0 %v2975_v8  ;;  %3004 = vmatprep.subr.bf16.mxu1 %v3003_v25  ;;  %v282_v37 = vld [vmem:[#allocation7 + $0xb8] sm:$0xff]  ;;  %v3639_v38 = vld [vmem:[#allocation5 + $0x60] sm:$0xff]  ;;  %v3641_v39 = vld [vmem:[#allocation5 + $0x68] sm:$0xff]  ;;  %v3009_v40 = vpack.c.bf16 %v264_v34, %v263_v33 }
  0x53   :  { %v3011_v41 = vpack.c.bf16 %v282_v37, %v281_v36  ;;  %v265_v42 = vld [vmem:[#allocation7 + $0x30] sm:$0xff]  ;;  %v266_v43 = vld [vmem:[#allocation7 + $0x38] sm:$0xff]  ;;  %v2991_v44 = vpack.c.bf16 %v3641_v39, %v3639_v38  ;;  %v283_v45 = vld [vmem:[#allocation7 + $0xc0] sm:$0xff] }
  0x54   :  { %v284_v46 = vld [vmem:[#allocation7 + $0xc8] sm:$0xff]  ;;  %v3645_v47 = vld [vmem:[#allocation5 + $0x70] sm:$0xff]  ;;  %v3647_v48 = vld [vmem:[#allocation5 + $0x78] sm:$0xff]  ;;  %v3013_v49 = vpack.c.bf16 %v266_v43, %v265_v42 }
  0x55   :  { %2978 = vmatpush3.bf16.msra.mxu0 %v2975_v8  ;;  %3006 = vmatpush3.bf16.msra.mxu1 %v3005_v31  ;;  %v3015_v50 = vpack.c.bf16 %v284_v46, %v283_v45  ;;  %v267_v51 = vld [vmem:[#allocation7 + $0x40] sm:$0xff]  ;;  %v268_v52 = vld [vmem:[#allocation7 + $0x48] sm:$0xff]  ;;  %v2995_v53 = vpack.c.bf16 %v3647_v48, %v3645_v47  ;;  %v285_v54 = vld [vmem:[#allocation7 + $0xd0] sm:$0xff] }
  0x56   :  { %2980 = vmatprep.subr.bf16.mxu0 %v2979_v12  ;;  %3008 = vmatprep.subr.bf16.mxu1 %v3007_v32  ;;  %v286_v55 = vld [vmem:[#allocation7 + $0xd8] sm:$0xff]  ;;  %v3017_v56 = vpack.c.bf16 %v268_v52, %v267_v51  ;;  %v269_v58 = vld [vmem:[#allocation7 + $0x50] sm:$0xff]  ;;  %v287_v60 = vld [vmem:[#allocation7 + $0xe0] sm:$0xff] }
  0x57   :  { %v3019_v57 = vpack.c.bf16 %v286_v55, %v285_v54  ;;  %v270_v59 = vld [vmem:[#allocation7 + $0x58] sm:$0xff]  ;;  %v288_v61 = vld [vmem:[#allocation7 + $0xe8] sm:$0xff]  ;;  %v271_v3 = vld [vmem:[#allocation7 + $0x60] sm:$0xff] }
  0x58   :  { %v3021_v62 = vpack.c.bf16 %v270_v59, %v269_v58  ;;  %v3651_v63 = vld [vmem:[#allocation2 + $0x8] sm:$0xff]  ;;  %v3023_v0 = vpack.c.bf16 %v288_v61, %v287_v60  ;;  %v3653_v8 = vld [vmem:[#allocation2 + $0x10] sm:$0xff]  ;;  %v290_v15 = vld [vmem:[#allocation7 + $0xf8] sm:$0xff] }
  0x59   :  { %2982 = vmatpush3.bf16.msra.mxu0 %v2979_v12  ;;  %3010 = vmatpush3.bf16.msra.mxu1 %v3009_v40  ;;  %v272_v5 = vld [vmem:[#allocation7 + $0x68] sm:$0xff]  ;;  %v289_v12 = vld [vmem:[#allocation7 + $0xf0] sm:$0xff]  ;;  %v3657_v17 = vld [vmem:[#allocation2 + $0x18] sm:$0xff] }
  0x5a   :  { %2984 = vmatprep.subr.bf16.mxu0 %v2983_v24  ;;  %3012 = vmatprep.subr.bf16.mxu1 %v3011_v41  ;;  %v3025_v16 = vpack.c.bf16 %v272_v5, %v271_v3  ;;  %v3027_v18 = vpack.c.bf16 %v290_v15, %v289_v12  ;;  %v273_v19 = vld [vmem:[#allocation7 + $0x70] sm:$0xff]  ;;  %v274_v20 = vld [vmem:[#allocation7 + $0x78] sm:$0xff]  ;;  %v3659_v21 = vld [vmem:[#allocation2 + $0x20] sm:$0xff] }
  0x5b   :  { %v3029_v22 = vpack.c.bf16 %v274_v20, %v273_v19  ;;  %v3663_v23 = vld [vmem:[#allocation2 + $0x28] sm:$0xff]  ;;  %v3669_v25 = vld [vmem:[#allocation2 + $0x38] sm:$0xff]  ;;  %v3671_v26 = vld [vmem:[#allocation2 + $0x40] sm:$0xff] }
  0x5c   :  { %v3675_v27 = vld [vmem:[#allocation2 + $0x48] sm:$0xff]  ;;  %v3677_v28 = vld [vmem:[#allocation2 + $0x50] sm:$0xff]  ;;  %v3681_v31 = vld [vmem:[#allocation2 + $0x58] sm:$0xff] }
  0x5d   :  { %2986 = vmatpush3.bf16.msra.mxu0 %v2983_v24  ;;  %3014 = vmatpush3.bf16.msra.mxu1 %v3013_v49  ;;  %v3665_v24 = vld [vmem:[#allocation2 + $0x30] sm:$0xff]  ;;  %v3683_v32 = vld [vmem:[#allocation2 + $0x60] sm:$0xff]  ;;  %v3687_v33 = vld [vmem:[#allocation2 + $0x68] sm:$0xff] }
  0x5e   :  { %2988 = vmatprep.subr.bf16.mxu0 %v2987_v35  ;;  %3016 = vmatprep.subr.bf16.mxu1 %v3015_v50  ;;  %v3689_v34 = vld [vmem:[#allocation2 + $0x70] sm:$0xff] }
  0x61   :  { %2990 = vmatpush3.bf16.msra.mxu0 %v2987_v35  ;;  %3018 = vmatpush3.bf16.msra.mxu1 %v3017_v56  ;;  %v3693_v35 = vld [vmem:[#allocation2 + $0x78] sm:$0xff] }
  0x62   :  { %2992 = vmatprep.subr.bf16.mxu0 %v2991_v44  ;;  %3020 = vmatprep.subr.bf16.mxu1 %v3019_v57 }
  0x65   :  { %2994 = vmatpush3.bf16.msra.mxu0 %v2991_v44  ;;  %3022 = vmatpush3.bf16.msra.mxu1 %v3021_v62 }
  0x66   :  { %2996 = vmatprep.subr.bf16.mxu0 %v2995_v53  ;;  %3024 = vmatprep.subr.bf16.mxu1 %v3023_v0 }
  0x69   :  { %2998 = vmatpush3.bf16.msra.mxu0 %v2995_v53  ;;  %3026 = vmatpush3.bf16.msra.mxu1 %v3025_v16 }
  0x6a   :  { %3028 = vmatprep.subr.bf16.mxu1 %v3027_v18 }
  0x6c   :  { %2650 = vmatmul.mubr.f32.vlgmr.msra.gmra.mrb[0].mxu0 %v3651_v63 }
  0x6d   :  { %2652 = vmatprep.mubr.f32.mxu0 %v3653_v8  ;;  %3030 = vmatpush3.bf16.msra.mxu1 %v3029_v22 }
  0x70   :  { %2653 = vmatmul.mubr.f32.gmra.mrb[2].mxu0 %v3657_v17 }
  0x71   :  { %2655 = vmatprep.mubr.f32.mxu0 %v3659_v21 }
  0x74   :  { %2656 = vmatmul.mubr.f32.gmra.mrb[4].mxu0 %v3663_v23 }
  0x75   :  { %2658 = vmatprep.mubr.f32.mxu0 %v3665_v24 }
  0x78   :  { %2659 = vmatmul.mubr.f32.gmra.mrb[6].mxu0 %v3669_v25 }
  0x79   :  { %2661 = vmatprep.mubr.f32.mxu0 %v3671_v26 }
  0x7c   :  { %2662 = vmatmul.mubr.f32.gmra.mrb[8].mxu0 %v3675_v27 }
  0x7d   :  { %2664 = vmatprep.mubr.f32.mxu0 %v3677_v28 }
  0x80   :  { %2665 = vmatmul.mubr.f32.gmra.mrb[10].mxu0 %v3681_v31 }
  0x81   :  { %2667 = vmatprep.mubr.f32.mxu0 %v3683_v32 }
  0x84   :  { %2668 = vmatmul.mubr.f32.gmra.mrb[12].mxu0 %v3687_v33 }
  0x85   :  { %2670 = vmatprep.mubr.f32.mxu0 %v3689_v34 }
  0x88   :  { %2671 = vmatmul.mubr.f32.gmra.mrb[14].mxu0 %v3693_v35 }
  0x89   :  { %2705 = vmatprep.mubr.f32.mxu0 %v3618_v9 }
 0x13f   :  { %v2651_v36 = vpop.f32.mrb[0].mxu0 }
 0x140   :  { %v180_v37 = vpop.f32.mrb[1].mxu0 }
 0x141   :  { %363 = vmatmul.mubr.f32.vlgmr.msra.gmra.mrb[0].mxu1 %v180_v37 }
 0x142   :  { %367 = vmatprep.mubr.f32.mxu1 %v3603_v1 }
 0x143   :  { %v2654_v40 = vpop.f32.mrb[2].mxu0 }
 0x144   :  { %v190_v41 = vpop.f32.mrb[3].mxu0 }
 0x145   :  { %368 = vmatmul.mubr.f32.gmra.mrb[2].mxu1 %v2651_v36 }
 0x146   :  { %372 = vmatprep.mubr.f32.mxu1 %v3605_v2 }
 0x147   :  { %v2657_v42 = vpop.f32.mrb[4].mxu0 }
 0x148   :  { %v200_v43 = vpop.f32.mrb[5].mxu0 }
 0x149   :  { %373 = vmatmul.mubr.f32.gmra.mrb[4].mxu1 %v190_v41 }
 0x14a   :  { %377 = vmatprep.mubr.f32.mxu1 %v3608_v4 }
 0x14b   :  { %v2660_v44 = vpop.f32.mrb[6].mxu0 }
 0x14c   :  { %v210_v45 = vpop.f32.mrb[7].mxu0 }
 0x14d   :  { %378 = vmatmul.mubr.f32.gmra.mrb[6].mxu1 %v2654_v40 }
 0x14e   :  { %382 = vmatprep.mubr.f32.mxu1 %v3612_v6 }
 0x14f   :  { %v2663_v46 = vpop.f32.mrb[8].mxu0 }
 0x150   :  { %v220_v49 = vpop.f32.mrb[9].mxu0 }
 0x151   :  { %383 = vmatmul.mubr.f32.gmra.mrb[8].mxu1 %v200_v43 }
 0x152   :  { %387 = vmatprep.mubr.f32.mxu1 %v3614_v7 }
 0x153   :  { %v2666_v1 = vpop.f32.mrb[10].mxu0 }
 0x154   :  { %v230_v50 = vpop.f32.mrb[11].mxu0 }
 0x155   :  { %388 = vmatmul.mubr.f32.gmra.mrb[10].mxu1 %v2657_v42 }
 0x156   :  { %392 = vmatprep.mubr.f32.mxu1 %v3620_v10 }
 0x157   :  { %v2669_v2 = vpop.f32.mrb[12].mxu0 }
 0x158   :  { %v240_v51 = vpop.f32.mrb[13].mxu0 }
 0x159   :  { %393 = vmatmul.mubr.f32.gmra.mrb[12].mxu1 %v210_v45 }
 0x15a   :  { %397 = vmatprep.mubr.f32.mxu1 %v3622_v11  ;;  %v3716_v11 = vld [vmem:[%s4398_s3] ss:$0 sm:$0xff] }
 0x15b   :  { %v2672_v4 = vpop.f32.mrb[14].mxu0 }
 0x15c   :  { %v250_v52 = vpop.f32.mrb[15].mxu0 }
 0x15d   :  { %398 = vmatmul.mubr.f32.gmra.mrb[14].mxu1 %v2660_v44 }
 0x15e   :  { %402 = vmatprep.mubr.f32.mxu1 %v3627_v13 }
 0x161   :  { %403 = vmatmul.mubr.f32.gmra.mrb[16].mxu1 %v220_v49 }
 0x162   :  { %407 = vmatprep.mubr.f32.mxu1 %v3629_v14 }
 0x165   :  { %408 = vmatmul.mubr.f32.gmra.mrb[18].mxu1 %v2663_v46 }
 0x166   :  { %412 = vmatprep.mubr.f32.mxu1 %v3633_v29 }
 0x169   :  { %413 = vmatmul.mubr.f32.gmra.mrb[20].mxu1 %v230_v50 }
 0x16a   :  { %417 = vmatprep.mubr.f32.mxu1 %v3635_v30 }
 0x16d   :  { %418 = vmatmul.mubr.f32.gmra.mrb[22].mxu1 %v2666_v1 }
 0x16e   :  { %422 = vmatprep.mubr.f32.mxu1 %v3639_v38 }
 0x171   :  { %423 = vmatmul.mubr.f32.gmra.mrb[24].mxu1 %v240_v51 }
 0x172   :  { %427 = vmatprep.mubr.f32.mxu1 %v3641_v39 }
 0x175   :  { %428 = vmatmul.mubr.f32.gmra.mrb[26].mxu1 %v2669_v2 }
 0x176   :  { %432 = vmatprep.mubr.f32.mxu1 %v3645_v47 }
 0x179   :  { %433 = vmatmul.mubr.f32.gmra.mrb[28].mxu1 %v250_v52 }
 0x17a   :  { %437 = vmatprep.mubr.f32.mxu1 %v3647_v48 }
 0x17d   :  { %438 = vmatmul.mubr.f32.gmra.mrb[30].mxu1 %v2672_v4 }
 0x17e   :  { %2761 = vmatprep.mubr.f32.mxu1 %v3618_v9 }
 0x214   :  { %v2087_v6 = vpop.f32.mrb[0].mxu1 }
 0x215   :  { %v2088_v7 = vpop.f32.mrb[1].mxu1 }
 0x216   :  { %v2089_v10 = vadd.f32 %v2088_v7, %v2087_v6 }
 0x218   :  { %v2090_v13 = vpop.f32.mrb[2].mxu1  ;;  %v3719_v29 = vadd.f32 %v2089_v10, %v3716_v11 }
 0x219   :  { %v2091_v14 = vpop.f32.mrb[3].mxu1 }
 0x21a   :  { %v2092_v30 = vadd.f32 %v2091_v14, %v2090_v13  ;;  %v443_v48 = vmax.f32 %v3719_v29, 0.0 }
 0x21c   :  { %v3722_v38 = vadd.f32 %v2092_v30, %v3716_v11  ;;  %v2093_v39 = vpop.f32.mrb[4].mxu1 }
 0x21d   :  { %v2094_v47 = vpop.f32.mrb[5].mxu1 }
 0x21e   :  { %v444_v53 = vmax.f32 %v3722_v38, 0.0  ;;  %v2095_v54 = vadd.f32 %v2094_v47, %v2093_v39 }
 0x220   :  { %v2096_v55 = vpop.f32.mrb[6].mxu1  ;;  %v3031_v56 = vpack.c.bf16 %v444_v53, %v443_v48  ;;  %v3731_v58 = vadd.f32 %v2095_v54, %v3716_v11 }
 0x221   :  { %v2097_v57 = vpop.f32.mrb[7].mxu1 }
 0x222   :  { %v2098_v59 = vadd.f32 %v2097_v57, %v2096_v55  ;;  %3032 = vmatprep.subr.bf16.mxu0 %v3031_v56  ;;  %v445_v0 = vmax.f32 %v3731_v58, 0.0 }
 0x223   :  { %3034 = vmatpush3.bf16.msra.mxu0 %v3031_v56 }
 0x224   :  { %v3734_v60 = vadd.f32 %v2098_v59, %v3716_v11  ;;  %v2099_v61 = vpop.f32.mrb[8].mxu1 }
 0x225   :  { %v2100_v62 = vpop.f32.mrb[9].mxu1 }
 0x226   :  { %v446_v3 = vmax.f32 %v3734_v60, 0.0  ;;  %v2101_v5 = vadd.f32 %v2100_v62, %v2099_v61 }
 0x228   :  { %v2102_v12 = vpop.f32.mrb[10].mxu1  ;;  %v3035_v15 = vpack.c.bf16 %v446_v3, %v445_v0  ;;  %v3743_v18 = vadd.f32 %v2101_v5, %v3716_v11 }
 0x229   :  { %v2103_v16 = vpop.f32.mrb[11].mxu1 }
 0x22a   :  { %v2104_v19 = vadd.f32 %v2103_v16, %v2102_v12  ;;  %3036 = vmatprep.subr.bf16.mxu0 %v3035_v15  ;;  %v447_v37 = vmax.f32 %v3743_v18, 0.0 }
 0x22b   :  { %3038 = vmatpush3.bf16.msra.mxu0 %v3035_v15 }
 0x22c   :  { %v3746_v20 = vadd.f32 %v2104_v19, %v3716_v11  ;;  %v2105_v22 = vpop.f32.mrb[12].mxu1 }
 0x22d   :  { %v2106_v36 = vpop.f32.mrb[13].mxu1 }
 0x22e   :  { %v448_v40 = vmax.f32 %v3746_v20, 0.0  ;;  %v2107_v41 = vadd.f32 %v2106_v36, %v2105_v22 }
 0x230   :  { %v2108_v42 = vpop.f32.mrb[14].mxu1  ;;  %v3039_v43 = vpack.c.bf16 %v448_v40, %v447_v37  ;;  %v3755_v45 = vadd.f32 %v2107_v41, %v3716_v11 }
 0x231   :  { %v2109_v44 = vpop.f32.mrb[15].mxu1 }
 0x232   :  { %v2110_v46 = vadd.f32 %v2109_v44, %v2108_v42  ;;  %3040 = vmatprep.subr.bf16.mxu0 %v3039_v43  ;;  %v449_v2 = vmax.f32 %v3755_v45, 0.0 }
 0x233   :  { %3042 = vmatpush3.bf16.msra.mxu0 %v3039_v43 }
 0x234   :  { %v3758_v49 = vadd.f32 %v2110_v46, %v3716_v11  ;;  %v2111_v1 = vpop.f32.mrb[16].mxu1 }
 0x235   :  { %v2112_v50 = vpop.f32.mrb[17].mxu1 }
 0x236   :  { %v450_v51 = vmax.f32 %v3758_v49, 0.0  ;;  %v2113_v4 = vadd.f32 %v2112_v50, %v2111_v1 }
 0x238   :  { %v2114_v52 = vpop.f32.mrb[18].mxu1  ;;  %v3043_v6 = vpack.c.bf16 %v450_v51, %v449_v2  ;;  %v3767_v10 = vadd.f32 %v2113_v4, %v3716_v11 }
 0x239   :  { %v2115_v7 = vpop.f32.mrb[19].mxu1 }
 0x23a   :  { %v2116_v13 = vadd.f32 %v2115_v7, %v2114_v52  ;;  %3044 = vmatprep.subr.bf16.mxu0 %v3043_v6  ;;  %v451_v47 = vmax.f32 %v3767_v10, 0.0 }
 0x23b   :  { %3046 = vmatpush3.bf16.msra.mxu0 %v3043_v6 }
 0x23c   :  { %v3770_v14 = vadd.f32 %v2116_v13, %v3716_v11  ;;  %v2117_v30 = vpop.f32.mrb[20].mxu1 }
 0x23d   :  { %v2118_v39 = vpop.f32.mrb[21].mxu1 }
 0x23e   :  { %v452_v54 = vmax.f32 %v3770_v14, 0.0  ;;  %v2119_v55 = vadd.f32 %v2118_v39, %v2117_v30 }
 0x240   :  { %v2120_v56 = vpop.f32.mrb[22].mxu1  ;;  %v3047_v57 = vpack.c.bf16 %v452_v54, %v451_v47  ;;  %v3779_v61 = vadd.f32 %v2119_v55, %v3716_v11 }
 0x241   :  { %v2121_v59 = vpop.f32.mrb[23].mxu1 }
 0x242   :  { %v2122_v62 = vadd.f32 %v2121_v59, %v2120_v56  ;;  %3048 = vmatprep.subr.bf16.mxu0 %v3047_v57  ;;  %v453_v16 = vmax.f32 %v3779_v61, 0.0  ;;  %v622_v59 = vld [vmem:[#allocation7 + $0x188] sm:$0xff] }
 0x243   :  { %3050 = vmatpush3.bf16.msra.mxu0 %v3047_v57  ;;  %v621_v57 = vld [vmem:[#allocation7 + $0x180] sm:$0xff] }
 0x244   :  { %v3782_v5 = vadd.f32 %v2122_v62, %v3716_v11  ;;  %v2123_v12 = vpop.f32.mrb[24].mxu1 }
 0x245   :  { %v2124_v15 = vpop.f32.mrb[25].mxu1 }
 0x246   :  { %v454_v19 = vmax.f32 %v3782_v5, 0.0  ;;  %v2125_v22 = vadd.f32 %v2124_v15, %v2123_v12 }
 0x248   :  { %v2126_v36 = vpop.f32.mrb[26].mxu1  ;;  %v3051_v41 = vpack.c.bf16 %v454_v19, %v453_v16  ;;  %v3791_v43 = vadd.f32 %v2125_v22, %v3716_v11  ;;  %v3063_v22 = vpack.c.bf16 %v622_v59, %v621_v57  ;;  %v609_v57 = vld [vmem:[#allocation7 + $0x120] sm:$0xff]  ;;  %v610_v59 = vld [vmem:[#allocation7 + $0x128] sm:$0xff] }
 0x249   :  { %v2127_v42 = vpop.f32.mrb[27].mxu1 }
 0x24a   :  { %v2128_v44 = vadd.f32 %v2127_v42, %v2126_v36  ;;  %3052 = vmatprep.subr.bf16.mxu0 %v3051_v41  ;;  %v455_v4 = vmax.f32 %v3791_v43, 0.0  ;;  %v605_v36 = vld [vmem:[#allocation7 + $0x100] sm:$0xff]  ;;  %v623_v42 = vld [vmem:[#allocation7 + $0x190] sm:$0xff] }
 0x24b   :  { %3054 = vmatpush3.bf16.msra.mxu0 %v3051_v41  ;;  %v606_v41 = vld [vmem:[#allocation7 + $0x108] sm:$0xff] }
 0x24c   :  { %v3794_v46 = vadd.f32 %v2128_v44, %v3716_v11  ;;  %v2129_v1 = vpop.f32.mrb[28].mxu1  ;;  %v624_v44 = vld [vmem:[#allocation7 + $0x198] sm:$0xff] }
 0x24d   :  { %v2130_v50 = vpop.f32.mrb[29].mxu1 }
 0x24e   :  { %v456_v52 = vmax.f32 %v3794_v46, 0.0  ;;  %v2131_v6 = vadd.f32 %v2130_v50, %v2129_v1  ;;  %v3067_v1 = vpack.c.bf16 %v624_v44, %v623_v42  ;;  %v607_v50 = vld [vmem:[#allocation7 + $0x110] sm:$0xff]  ;;  %v629_v42 = vld [vmem:[#allocation7 + $0x1c0] sm:$0xff]  ;;  %v630_v44 = vld [vmem:[#allocation7 + $0x1c8] sm:$0xff] }
 0x250   :  { %v2132_v7 = vpop.f32.mrb[30].mxu1  ;;  %v3055_v13 = vpack.c.bf16 %v456_v52, %v455_v4  ;;  %v3803_v39 = vadd.f32 %v2131_v6, %v3716_v11  ;;  %v608_v6 = vld [vmem:[#allocation7 + $0x118] sm:$0xff] }
 0x251   :  { %v2133_v30 = vpop.f32.mrb[31].mxu1 }
 0x252   :  { %v2134_v55 = vadd.f32 %v2133_v30, %v2132_v7  ;;  %3056 = vmatprep.subr.bf16.mxu0 %v3055_v13  ;;  %v4404_v62 = vmax.f32 %v3803_v39, 0.0  ;;  %v625_v7 = vld [vmem:[#allocation7 + $0x1a0] sm:$0xff]  ;;  %v3069_v30 = vpack.c.bf16 %v608_v6, %v607_v50  ;;  %v614_v6 = vld [vmem:[#allocation7 + $0x148] sm:$0xff]  ;;  %v4407_v20 = vmax.f32 %v3803_v39, 0.0 }
 0x253   :  { %3058 = vmatpush3.bf16.msra.mxu0 %v3055_v13  ;;  %v626_v13 = vld [vmem:[#allocation7 + $0x1a8] sm:$0xff]  ;;  %v613_v50 = vld [vmem:[#allocation7 + $0x140] sm:$0xff] }
 0x254   :  { %v3806_v56 = vadd.f32 %v2134_v55, %v3716_v11  ;;  %v3065_v11 = vpack.c.bf16 %v606_v41, %v605_v36  ;;  %v3071_v55 = vpack.c.bf16 %v626_v13, %v625_v7  ;;  %v611_v36 = vld [vmem:[#allocation7 + $0x130] sm:$0xff]  ;;  %v612_v41 = vld [vmem:[#allocation7 + $0x138] sm:$0xff] }
 0x255   :  { %v631_v7 = vld [vmem:[#allocation7 + $0x1d0] sm:$0xff]  ;;  %v632_v13 = vld [vmem:[#allocation7 + $0x1d8] sm:$0xff] }
 0x256   :  { %v4403_v12 = vmax.f32 %v3806_v56, 0.0 }
 0x258   :  { %v3059_v15 = vpack.c.bf16 %v4403_v12, %v4404_v62  ;;  %v627_v12 = vld [vmem:[#allocation7 + $0x1b0] sm:$0xff]  ;;  %v628_v62 = vld [vmem:[#allocation7 + $0x1b8] sm:$0xff] }
 0x25a   :  { %3060 = vmatprep.subr.bf16.mxu0 %v3059_v15 }
 0x25b   :  { %3062 = vmatpush3.bf16.msra.mxu0 %v3059_v15  ;;  %v3073_v15 = vpack.c.bf16 %v610_v59, %v609_v57  ;;  %v633_v57 = vld [vmem:[#allocation7 + $0x1e0] sm:$0xff]  ;;  %v634_v59 = vld [vmem:[#allocation7 + $0x1e8] sm:$0xff] }
 0x25c   :  { %3064 = vmatprep.subr.bf16.mxu0 %v3063_v22  ;;  %v3075_v22 = vpack.c.bf16 %v628_v62, %v627_v12  ;;  %v3081_v62 = vpack.c.bf16 %v614_v6, %v613_v50  ;;  %v3083_v12 = vpack.c.bf16 %v632_v13, %v631_v7  ;;  %v619_v50 = vld [vmem:[#allocation7 + $0x170] sm:$0xff]  ;;  %v620_v6 = vld [vmem:[#allocation7 + $0x178] sm:$0xff] }
 0x25d   :  { %v3093_v7 = vpack.c.bf16 %v620_v6, %v619_v50 }
 0x25e   :  { %2706 = vmatmul.mubr.f32.vlgmr.msra.gmra.mrb[16].mxu0 %v3651_v63 }
 0x25f   :  { %2708 = vmatprep.mubr.f32.mxu0 %v3653_v8  ;;  %3066 = vmatpush3.bf16.msra.mxu0 %v3065_v11  ;;  %v3077_v11 = vpack.c.bf16 %v612_v41, %v611_v36  ;;  %v617_v36 = vld [vmem:[#allocation7 + $0x160] sm:$0xff]  ;;  %v618_v41 = vld [vmem:[#allocation7 + $0x168] sm:$0xff] }
 0x260   :  { %3068 = vmatprep.subr.bf16.mxu0 %v3067_v1  ;;  %v3079_v1 = vpack.c.bf16 %v630_v44, %v629_v42  ;;  %v635_v42 = vld [vmem:[#allocation7 + $0x1f0] sm:$0xff]  ;;  %v636_v44 = vld [vmem:[#allocation7 + $0x1f8] sm:$0xff] }
 0x262   :  { %2709 = vmatmul.mubr.f32.gmra.mrb[18].mxu0 %v3657_v17 }
 0x263   :  { %2711 = vmatprep.mubr.f32.mxu0 %v3659_v21  ;;  %3070 = vmatpush3.bf16.msra.mxu0 %v3069_v30  ;;  %v615_v30 = vld [vmem:[#allocation7 + $0x150] sm:$0xff] }
 0x264   :  { %3072 = vmatprep.subr.bf16.mxu0 %v3071_v55  ;;  %v616_v55 = vld [vmem:[#allocation7 + $0x158] sm:$0xff] }
 0x266   :  { %2712 = vmatmul.mubr.f32.gmra.mrb[20].mxu0 %v3663_v23 }
 0x267   :  { %2714 = vmatprep.mubr.f32.mxu0 %v3665_v24  ;;  %3074 = vmatpush3.bf16.msra.mxu0 %v3073_v15  ;;  %v3085_v15 = vpack.c.bf16 %v616_v55, %v615_v30 }
 0x268   :  { %3076 = vmatprep.subr.bf16.mxu0 %v3075_v22  ;;  %v3087_v22 = vpack.c.bf16 %v634_v59, %v633_v57 }
 0x26a   :  { %2715 = vmatmul.mubr.f32.gmra.mrb[22].mxu0 %v3669_v25 }
 0x26b   :  { %2717 = vmatprep.mubr.f32.mxu0 %v3671_v26  ;;  %3078 = vmatpush3.bf16.msra.mxu0 %v3077_v11  ;;  %v3089_v11 = vpack.c.bf16 %v618_v41, %v617_v36 }
 0x26c   :  { %3080 = vmatprep.subr.bf16.mxu0 %v3079_v1  ;;  %v3091_v1 = vpack.c.bf16 %v636_v44, %v635_v42 }
 0x26e   :  { %2718 = vmatmul.mubr.f32.gmra.mrb[24].mxu0 %v3675_v27 }
 0x26f   :  { %2720 = vmatprep.mubr.f32.mxu0 %v3677_v28  ;;  %3082 = vmatpush3.bf16.msra.mxu0 %v3081_v62 }
 0x270   :  { %3084 = vmatprep.subr.bf16.mxu0 %v3083_v12 }
 0x272   :  { %2721 = vmatmul.mubr.f32.gmra.mrb[26].mxu0 %v3681_v31 }
 0x273   :  { %2723 = vmatprep.mubr.f32.mxu0 %v3683_v32  ;;  %3086 = vmatpush3.bf16.msra.mxu0 %v3085_v15 }
 0x274   :  { %3088 = vmatprep.subr.bf16.mxu0 %v3087_v22 }
 0x276   :  { %2724 = vmatmul.mubr.f32.gmra.mrb[28].mxu0 %v3687_v33 }
 0x277   :  { %2726 = vmatprep.mubr.f32.mxu0 %v3689_v34  ;;  %3090 = vmatpush3.bf16.msra.mxu0 %v3089_v11 }
 0x278   :  { %3092 = vmatprep.subr.bf16.mxu0 %v3091_v1 }
 0x27a   :  { %2727 = vmatmul.mubr.f32.gmra.mrb[30].mxu0 %v3693_v35 }
 0x27b   :  { %709 = vmatprep.mubr.f32.mxu0 %v443_v48  ;;  %3094 = vmatpush3.bf16.msra.mxu0 %v3093_v7 }
 0x331   :  { %v2707_v13 = vpop.f32.mrb[16].mxu0 }
 0x332   :  { %v525_v62 = vpop.f32.mrb[17].mxu0 }
 0x333   :  { %710 = vmatmul.mubr.f32.vlgmr.msra.gmra.mrb[32].mxu0 %v525_v62 }
 0x334   :  { %714 = vmatprep.mubr.f32.mxu0 %v444_v53 }
 0x335   :  { %v2710_v12 = vpop.f32.mrb[18].mxu0 }
 0x336   :  { %v535_v30 = vpop.f32.mrb[19].mxu0 }
 0x337   :  { %715 = vmatmul.mubr.f32.gmra.mrb[34].mxu0 %v2707_v13 }
 0x338   :  { %719 = vmatprep.mubr.f32.mxu0 %v445_v0 }
 0x339   :  { %v2713_v55 = vpop.f32.mrb[20].mxu0 }
 0x33a   :  { %v545_v57 = vpop.f32.mrb[21].mxu0 }
 0x33b   :  { %720 = vmatmul.mubr.f32.gmra.mrb[36].mxu0 %v535_v30 }
 0x33c   :  { %724 = vmatprep.mubr.f32.mxu0 %v446_v3 }
 0x33d   :  { %v2716_v29 = vpop.f32.mrb[22].mxu0 }
 0x33e   :  { %v555_v48 = vpop.f32.mrb[23].mxu0 }
 0x33f   :  { %725 = vmatmul.mubr.f32.gmra.mrb[38].mxu0 %v2710_v12 }
 0x340   :  { %729 = vmatprep.mubr.f32.mxu0 %v447_v37 }
 0x341   :  { %v2719_v38 = vpop.f32.mrb[24].mxu0 }
 0x342   :  { %v565_v53 = vpop.f32.mrb[25].mxu0 }
 0x343   :  { %730 = vmatmul.mubr.f32.gmra.mrb[40].mxu0 %v545_v57 }
 0x344   :  { %734 = vmatprep.mubr.f32.mxu0 %v448_v40  ;;  %v4408_v40 = vmax.f32 %v3806_v56, 0.0 }
 0x345   :  { %v2722_v58 = vpop.f32.mrb[26].mxu0 }
 0x346   :  { %v575_v0 = vpop.f32.mrb[27].mxu0 }
 0x347   :  { %735 = vmatmul.mubr.f32.gmra.mrb[42].mxu0 %v2713_v55 }
 0x348   :  { %739 = vmatprep.mubr.f32.mxu0 %v449_v2 }
 0x349   :  { %v2725_v60 = vpop.f32.mrb[28].mxu0 }
 0x34a   :  { %v585_v3 = vpop.f32.mrb[29].mxu0 }
 0x34b   :  { %740 = vmatmul.mubr.f32.gmra.mrb[44].mxu0 %v555_v48 }
 0x34c   :  { %744 = vmatprep.mubr.f32.mxu0 %v450_v51  ;;  %v3865_v51 = vld [vmem:[%s4398_s3 + $0x1] ss:$0 sm:$0xff] }
 0x34d   :  { %v2728_v18 = vpop.f32.mrb[30].mxu0 }
 0x34e   :  { %v595_v37 = vpop.f32.mrb[31].mxu0 }
 0x34f   :  { %745 = vmatmul.mubr.f32.gmra.mrb[46].mxu0 %v2716_v29 }
 0x350   :  { %749 = vmatprep.mubr.f32.mxu0 %v451_v47 }
 0x353   :  { %750 = vmatmul.mubr.f32.gmra.mrb[48].mxu0 %v565_v53 }
 0x354   :  { %754 = vmatprep.mubr.f32.mxu0 %v452_v54 }
 0x357   :  { %755 = vmatmul.mubr.f32.gmra.mrb[50].mxu0 %v2719_v38 }
 0x358   :  { %759 = vmatprep.mubr.f32.mxu0 %v453_v16 }
 0x35b   :  { %760 = vmatmul.mubr.f32.gmra.mrb[52].mxu0 %v575_v0 }
 0x35c   :  { %764 = vmatprep.mubr.f32.mxu0 %v454_v19 }
 0x35f   :  { %765 = vmatmul.mubr.f32.gmra.mrb[54].mxu0 %v2722_v58 }
 0x360   :  { %769 = vmatprep.mubr.f32.mxu0 %v455_v4 }
 0x363   :  { %770 = vmatmul.mubr.f32.gmra.mrb[56].mxu0 %v585_v3 }
 0x364   :  { %774 = vmatprep.mubr.f32.mxu0 %v456_v52 }
 0x367   :  { %775 = vmatmul.mubr.f32.gmra.mrb[58].mxu0 %v2725_v60 }
 0x368   :  { %779 = vmatprep.mubr.f32.mxu0 %v4407_v20 }
 0x36b   :  { %780 = vmatmul.mubr.f32.gmra.mrb[60].mxu0 %v595_v37 }
 0x36c   :  { %784 = vmatprep.mubr.f32.mxu0 %v4408_v40 }
 0x36f   :  { %785 = vmatmul.mubr.f32.gmra.mrb[62].mxu0 %v2728_v18 }
 0x370   :  { %2817 = vmatprep.mubr.f32.mxu0 %v3618_v9 }
 0x406   :  { %v2199_v45 = vpop.f32.mrb[32].mxu0 }
 0x407   :  { %v2200_v49 = vpop.f32.mrb[33].mxu0 }
 0x408   :  { %v2201_v2 = vadd.f32 %v2200_v49, %v2199_v45 }
 0x40a   :  { %v2202_v10 = vpop.f32.mrb[34].mxu0  ;;  %v3868_v47 = vadd.f32 %v2201_v2, %v3865_v51 }
 0x40b   :  { %v2203_v14 = vpop.f32.mrb[35].mxu0 }
 0x40c   :  { %v2204_v54 = vadd.f32 %v2203_v14, %v2202_v10  ;;  %v790_v9 = vmax.f32 %v3868_v47, 0.0 }
 0x40e   :  { %v3871_v61 = vadd.f32 %v2204_v54, %v3865_v51  ;;  %v2205_v5 = vpop.f32.mrb[36].mxu0 }
 0x40f   :  { %v2206_v16 = vpop.f32.mrb[37].mxu0 }
 0x410   :  { %v791_v19 = vmax.f32 %v3871_v61, 0.0  ;;  %v2207_v43 = vadd.f32 %v2206_v16, %v2205_v5 }
 0x412   :  { %v2208_v46 = vpop.f32.mrb[38].mxu0  ;;  %v3095_v4 = vpack.c.bf16 %v791_v19, %v790_v9  ;;  %v3880_v39 = vadd.f32 %v2207_v43, %v3865_v51 }
 0x413   :  { %v2209_v52 = vpop.f32.mrb[39].mxu0 }
 0x414   :  { %v2210_v56 = vadd.f32 %v2209_v52, %v2208_v46  ;;  %3096 = vmatprep.subr.bf16.mxu1 %v3095_v4  ;;  %v792_v36 = vmax.f32 %v3880_v39, 0.0 }
 0x415   :  { %3098 = vmatpush3.bf16.msra.mxu1 %v3095_v4 }
 0x416   :  { %v3883_v59 = vadd.f32 %v2210_v56, %v3865_v51  ;;  %v2211_v15 = vpop.f32.mrb[40].mxu0 }
 0x417   :  { %v2212_v22 = vpop.f32.mrb[41].mxu0 }
 0x418   :  { %v793_v41 = vmax.f32 %v3883_v59, 0.0  ;;  %v2213_v42 = vadd.f32 %v2212_v22, %v2211_v15 }
 0x41a   :  { %v2214_v44 = vpop.f32.mrb[42].mxu0  ;;  %v3099_v11 = vpack.c.bf16 %v793_v41, %v792_v36  ;;  %v3892_v50 = vadd.f32 %v2213_v42, %v3865_v51 }
 0x41b   :  { %v2215_v1 = vpop.f32.mrb[43].mxu0 }
 0x41c   :  { %v2216_v6 = vadd.f32 %v2215_v1, %v2214_v44  ;;  %3100 = vmatprep.subr.bf16.mxu1 %v3099_v11  ;;  %v794_v12 = vmax.f32 %v3892_v50, 0.0 }
 0x41d   :  { %3102 = vmatpush3.bf16.msra.mxu1 %v3099_v11 }
 0x41e   :  { %v3895_v7 = vadd.f32 %v2216_v6, %v3865_v51  ;;  %v2217_v13 = vpop.f32.mrb[44].mxu0 }
 0x41f   :  { %v2218_v62 = vpop.f32.mrb[45].mxu0 }
 0x420   :  { %v795_v30 = vmax.f32 %v3895_v7, 0.0  ;;  %v2219_v55 = vadd.f32 %v2218_v62, %v2217_v13 }
 0x422   :  { %v2220_v57 = vpop.f32.mrb[46].mxu0  ;;  %v3103_v29 = vpack.c.bf16 %v795_v30, %v794_v12  ;;  %v3904_v38 = vadd.f32 %v2219_v55, %v3865_v51 }
 0x423   :  { %v2221_v48 = vpop.f32.mrb[47].mxu0 }
 0x424   :  { %v2222_v53 = vadd.f32 %v2221_v48, %v2220_v57  ;;  %3104 = vmatprep.subr.bf16.mxu1 %v3103_v29  ;;  %v796_v3 = vmax.f32 %v3904_v38, 0.0 }
 0x425   :  { %3106 = vmatpush3.bf16.msra.mxu1 %v3103_v29 }
 0x426   :  { %v3907_v58 = vadd.f32 %v2222_v53, %v3865_v51  ;;  %v2223_v0 = vpop.f32.mrb[48].mxu0 }
 0x427   :  { %v2224_v60 = vpop.f32.mrb[49].mxu0 }
 0x428   :  { %v797_v18 = vmax.f32 %v3907_v58, 0.0  ;;  %v2225_v37 = vadd.f32 %v2224_v60, %v2223_v0 }
 0x42a   :  { %v2226_v20 = vpop.f32.mrb[50].mxu0  ;;  %v3107_v40 = vpack.c.bf16 %v797_v18, %v796_v3  ;;  %v3916_v49 = vadd.f32 %v2225_v37, %v3865_v51 }
 0x42b   :  { %v2227_v45 = vpop.f32.mrb[51].mxu0 }
 0x42c   :  { %v2228_v2 = vadd.f32 %v2227_v45, %v2226_v20  ;;  %3108 = vmatprep.subr.bf16.mxu1 %v3107_v40  ;;  %v798_v5 = vmax.f32 %v3916_v49, 0.0 }
 0x42d   :  { %3110 = vmatpush3.bf16.msra.mxu1 %v3107_v40 }
 0x42e   :  { %v3919_v10 = vadd.f32 %v2228_v2, %v3865_v51  ;;  %v2229_v14 = vpop.f32.mrb[52].mxu0 }
 0x42f   :  { %v2230_v54 = vpop.f32.mrb[53].mxu0 }
 0x430   :  { %v799_v16 = vmax.f32 %v3919_v10, 0.0  ;;  %v2231_v43 = vadd.f32 %v2230_v54, %v2229_v14 }
 0x432   :  { %v2232_v46 = vpop.f32.mrb[54].mxu0  ;;  %v3111_v4 = vpack.c.bf16 %v799_v16, %v798_v5  ;;  %v3928_v56 = vadd.f32 %v2231_v43, %v3865_v51 }
 0x433   :  { %v2233_v52 = vpop.f32.mrb[55].mxu0 }
 0x434   :  { %v2234_v15 = vadd.f32 %v2233_v52, %v2232_v46  ;;  %3112 = vmatprep.subr.bf16.mxu1 %v3111_v4  ;;  %v800_v11 = vmax.f32 %v3928_v56, 0.0  ;;  %v968_v46 = vld [vmem:[#allocation7 + $0x280] sm:$0xff] }
 0x435   :  { %3114 = vmatpush3.bf16.msra.mxu1 %v3111_v4  ;;  %v969_v4 = vld [vmem:[#allocation7 + $0x288] sm:$0xff] }
 0x436   :  { %v3931_v22 = vadd.f32 %v2234_v15, %v3865_v51  ;;  %v2235_v42 = vpop.f32.mrb[56].mxu0 }
 0x437   :  { %v2236_v44 = vpop.f32.mrb[57].mxu0 }
 0x438   :  { %v801_v1 = vmax.f32 %v3931_v22, 0.0  ;;  %v2237_v6 = vadd.f32 %v2236_v44, %v2235_v42  ;;  %v3127_v44 = vpack.c.bf16 %v969_v4, %v968_v46  ;;  %v957_v46 = vld [vmem:[#allocation7 + $0x228] sm:$0xff]  ;;  %v974_v4 = vld [vmem:[#allocation7 + $0x2b0] sm:$0xff] }
 0x43a   :  { %v2238_v13 = vpop.f32.mrb[58].mxu0  ;;  %v3115_v62 = vpack.c.bf16 %v801_v1, %v800_v11  ;;  %v3940_v57 = vadd.f32 %v2237_v6, %v3865_v51  ;;  %v952_v6 = vld [vmem:[#allocation7 + $0x200] sm:$0xff] }
 0x43b   :  { %v2239_v55 = vpop.f32.mrb[59].mxu0 }
 0x43c   :  { %v2240_v29 = vadd.f32 %v2239_v55, %v2238_v13  ;;  %3116 = vmatprep.subr.bf16.mxu1 %v3115_v62  ;;  %v802_v60 = vmax.f32 %v3940_v57, 0.0  ;;  %v953_v13 = vld [vmem:[#allocation7 + $0x208] sm:$0xff]  ;;  %v971_v55 = vld [vmem:[#allocation7 + $0x298] sm:$0xff] }
 0x43d   :  { %3118 = vmatpush3.bf16.msra.mxu1 %v3115_v62  ;;  %v970_v62 = vld [vmem:[#allocation7 + $0x290] sm:$0xff] }
 0x43e   :  { %v3943_v48 = vadd.f32 %v2240_v29, %v3865_v51  ;;  %v2241_v53 = vpop.f32.mrb[60].mxu0  ;;  %v3131_v29 = vpack.c.bf16 %v971_v55, %v970_v62 }
 0x43f   :  { %v2242_v0 = vpop.f32.mrb[61].mxu0 }
 0x440   :  { %v803_v37 = vmax.f32 %v3943_v48, 0.0  ;;  %v2243_v20 = vadd.f32 %v2242_v0, %v2241_v53  ;;  %v954_v53 = vld [vmem:[#allocation7 + $0x210] sm:$0xff]  ;;  %v955_v0 = vld [vmem:[#allocation7 + $0x218] sm:$0xff] }
 0x442   :  { %v2244_v40 = vpop.f32.mrb[62].mxu0  ;;  %v3119_v45 = vpack.c.bf16 %v803_v37, %v802_v60  ;;  %v3952_v14 = vadd.f32 %v2243_v20, %v3865_v51  ;;  %v972_v20 = vld [vmem:[#allocation7 + $0x2a0] sm:$0xff] }
 0x443   :  { %v2245_v2 = vpop.f32.mrb[63].mxu0 }
 0x444   :  { %v2246_v54 = vadd.f32 %v2245_v2, %v2244_v40  ;;  %3120 = vmatprep.subr.bf16.mxu1 %v3119_v45  ;;  %v804_v52 = vmax.f32 %v3952_v14, 0.0  ;;  %v973_v40 = vld [vmem:[#allocation7 + $0x2a8] sm:$0xff] }
 0x445   :  { %3122 = vmatpush3.bf16.msra.mxu1 %v3119_v45  ;;  %v3133_v45 = vpack.c.bf16 %v955_v0, %v954_v53  ;;  %v3135_v2 = vpack.c.bf16 %v973_v40, %v972_v20  ;;  %v962_v0 = vld [vmem:[#allocation7 + $0x250] sm:$0xff]  ;;  %v980_v20 = vld [vmem:[#allocation7 + $0x2e0] sm:$0xff] }
 0x446   :  { %v3955_v43 = vadd.f32 %v2246_v54, %v3865_v51  ;;  %v3129_v51 = vpack.c.bf16 %v953_v13, %v952_v6  ;;  %v956_v54 = vld [vmem:[#allocation7 + $0x220] sm:$0xff]  ;;  %v958_v6 = vld [vmem:[#allocation7 + $0x230] sm:$0xff] }
 0x447   :  { %v976_v13 = vld [vmem:[#allocation7 + $0x2c0] sm:$0xff] }
 0x448   :  { %v4405_v15 = vmax.f32 %v3955_v43, 0.0  ;;  %v4409_v7 = vmax.f32 %v3955_v43, 0.0 }
 0x44a   :  { %v3123_v42 = vpack.c.bf16 %v4405_v15, %v804_v52  ;;  %v975_v15 = vld [vmem:[#allocation7 + $0x2b8] sm:$0xff] }
 0x44c   :  { %3124 = vmatprep.subr.bf16.mxu1 %v3123_v42 }
 0x44d   :  { %3126 = vmatpush3.bf16.msra.mxu1 %v3123_v42  ;;  %v3137_v42 = vpack.c.bf16 %v957_v46, %v956_v54  ;;  %v982_v54 = vld [vmem:[#allocation7 + $0x2f0] sm:$0xff] }
 0x44e   :  { %3128 = vmatprep.subr.bf16.mxu1 %v3127_v44  ;;  %v3139_v44 = vpack.c.bf16 %v975_v15, %v974_v4 }
 0x450   :  { %2762 = vmatmul.mubr.f32.vlgmr.msra.gmra.mrb[32].mxu1 %v3651_v63  ;;  %v959_v63 = vld [vmem:[#allocation7 + $0x238] sm:$0xff] }
 0x451   :  { %2764 = vmatprep.mubr.f32.mxu1 %v3653_v8  ;;  %3130 = vmatpush3.bf16.msra.mxu1 %v3129_v51  ;;  %v977_v8 = vld [vmem:[#allocation7 + $0x2c8] sm:$0xff]  ;;  %v3141_v62 = vpack.c.bf16 %v959_v63, %v958_v6  ;;  %v960_v51 = vld [vmem:[#allocation7 + $0x240] sm:$0xff] }
 0x452   :  { %3132 = vmatprep.subr.bf16.mxu1 %v3131_v29  ;;  %v3143_v55 = vpack.c.bf16 %v977_v8, %v976_v13  ;;  %v978_v29 = vld [vmem:[#allocation7 + $0x2d0] sm:$0xff] }
 0x454   :  { %2765 = vmatmul.mubr.f32.gmra.mrb[34].mxu1 %v3657_v17  ;;  %v961_v17 = vld [vmem:[#allocation7 + $0x248] sm:$0xff] }
 0x455   :  { %2767 = vmatprep.mubr.f32.mxu1 %v3659_v21  ;;  %3134 = vmatpush3.bf16.msra.mxu1 %v3133_v45  ;;  %v979_v21 = vld [vmem:[#allocation7 + $0x2d8] sm:$0xff]  ;;  %v3145_v15 = vpack.c.bf16 %v961_v17, %v960_v51 }
 0x456   :  { %3136 = vmatprep.subr.bf16.mxu1 %v3135_v2  ;;  %v3147_v53 = vpack.c.bf16 %v979_v21, %v978_v29  ;;  %v964_v2 = vld [vmem:[#allocation7 + $0x260] sm:$0xff] }
 0x458   :  { %2768 = vmatmul.mubr.f32.gmra.mrb[36].mxu1 %v3663_v23  ;;  %v963_v23 = vld [vmem:[#allocation7 + $0x258] sm:$0xff] }
 0x459   :  { %2770 = vmatprep.mubr.f32.mxu1 %v3665_v24  ;;  %3138 = vmatpush3.bf16.msra.mxu1 %v3137_v42  ;;  %v981_v24 = vld [vmem:[#allocation7 + $0x2e8] sm:$0xff]  ;;  %v3149_v40 = vpack.c.bf16 %v963_v23, %v962_v0  ;;  %v966_v42 = vld [vmem:[#allocation7 + $0x270] sm:$0xff] }
 0x45a   :  { %3140 = vmatprep.subr.bf16.mxu1 %v3139_v44  ;;  %v3151_v45 = vpack.c.bf16 %v981_v24, %v980_v20 }
 0x45c   :  { %2771 = vmatmul.mubr.f32.gmra.mrb[38].mxu1 %v3669_v25  ;;  %v965_v25 = vld [vmem:[#allocation7 + $0x268] sm:$0xff] }
 0x45d   :  { %2773 = vmatprep.mubr.f32.mxu1 %v3671_v26  ;;  %3142 = vmatpush3.bf16.msra.mxu1 %v3141_v62  ;;  %v983_v26 = vld [vmem:[#allocation7 + $0x2f8] sm:$0xff]  ;;  %v3153_v46 = vpack.c.bf16 %v965_v25, %v964_v2 }
 0x45e   :  { %3144 = vmatprep.subr.bf16.mxu1 %v3143_v55  ;;  %v3155_v4 = vpack.c.bf16 %v983_v26, %v982_v54 }
 0x460   :  { %2774 = vmatmul.mubr.f32.gmra.mrb[40].mxu1 %v3675_v27  ;;  %v967_v27 = vld [vmem:[#allocation7 + $0x278] sm:$0xff] }
 0x461   :  { %2776 = vmatprep.mubr.f32.mxu1 %v3677_v28  ;;  %3146 = vmatpush3.bf16.msra.mxu1 %v3145_v15  ;;  %v3157_v28 = vpack.c.bf16 %v967_v27, %v966_v42 }
 0x462   :  { %3148 = vmatprep.subr.bf16.mxu1 %v3147_v53 }
 0x464   :  { %2777 = vmatmul.mubr.f32.gmra.mrb[42].mxu1 %v3681_v31 }
 0x465   :  { %2779 = vmatprep.mubr.f32.mxu1 %v3683_v32  ;;  %3150 = vmatpush3.bf16.msra.mxu1 %v3149_v40 }
 0x466   :  { %3152 = vmatprep.subr.bf16.mxu1 %v3151_v45 }
 0x468   :  { %2780 = vmatmul.mubr.f32.gmra.mrb[44].mxu1 %v3687_v33 }
 0x469   :  { %2782 = vmatprep.mubr.f32.mxu1 %v3689_v34  ;;  %3154 = vmatpush3.bf16.msra.mxu1 %v3153_v46 }
 0x46a   :  { %3156 = vmatprep.subr.bf16.mxu1 %v3155_v4 }
 0x46c   :  { %2783 = vmatmul.mubr.f32.gmra.mrb[46].mxu1 %v3693_v35 }
 0x46d   :  { %1056 = vmatprep.mubr.f32.mxu1 %v790_v9  ;;  %3158 = vmatpush3.bf16.msra.mxu1 %v3157_v28 }
 0x523   :  { %v2763_v31 = vpop.f32.mrb[32].mxu1 }
 0x524   :  { %v872_v32 = vpop.f32.mrb[33].mxu1 }
 0x525   :  { %1057 = vmatmul.mubr.f32.vlgmr.msra.gmra.mrb[48].mxu1 %v872_v32 }
 0x526   :  { %1061 = vmatprep.mubr.f32.mxu1 %v791_v19 }
 0x527   :  { %v2766_v44 = vpop.f32.mrb[34].mxu1 }
 0x528   :  { %v882_v6 = vpop.f32.mrb[35].mxu1 }
 0x529   :  { %1062 = vmatmul.mubr.f32.gmra.mrb[50].mxu1 %v2763_v31 }
 0x52a   :  { %1066 = vmatprep.mubr.f32.mxu1 %v792_v36 }
 0x52b   :  { %v2769_v33 = vpop.f32.mrb[36].mxu1 }
 0x52c   :  { %v892_v34 = vpop.f32.mrb[37].mxu1 }
 0x52d   :  { %1067 = vmatmul.mubr.f32.gmra.mrb[52].mxu1 %v882_v6 }
 0x52e   :  { %1071 = vmatprep.mubr.f32.mxu1 %v793_v41 }
 0x52f   :  { %v2772_v35 = vpop.f32.mrb[38].mxu1 }
 0x530   :  { %v902_v47 = vpop.f32.mrb[39].mxu1 }
 0x531   :  { %1072 = vmatmul.mubr.f32.gmra.mrb[54].mxu1 %v2766_v44 }
 0x532   :  { %1076 = vmatprep.mubr.f32.mxu1 %v794_v12  ;;  %v3345_v12 = vld [vmem:[#allocation2] sm:$0xff] }
 0x533   :  { %v2775_v61 = vpop.f32.mrb[40].mxu1 }
 0x534   :  { %v912_v9 = vpop.f32.mrb[41].mxu1 }
 0x535   :  { %1077 = vmatmul.mubr.f32.gmra.mrb[56].mxu1 %v892_v34 }
 0x536   :  { %1081 = vmatprep.mubr.f32.mxu1 %v795_v30 }
 0x537   :  { %v2778_v19 = vpop.f32.mrb[42].mxu1 }
 0x538   :  { %v922_v39 = vpop.f32.mrb[43].mxu1 }
 0x539   :  { %1082 = vmatmul.mubr.f32.gmra.mrb[58].mxu1 %v2769_v33 }
 0x53a   :  { %1086 = vmatprep.mubr.f32.mxu1 %v796_v3  ;;  %v4013_v3 = vld [vmem:[%s4398_s3 + $0x2] ss:$0 sm:$0xff] }
 0x53b   :  { %v2781_v59 = vpop.f32.mrb[44].mxu1 }
 0x53c   :  { %v932_v36 = vpop.f32.mrb[45].mxu1 }
 0x53d   :  { %1087 = vmatmul.mubr.f32.gmra.mrb[60].mxu1 %v902_v47 }
 0x53e   :  { %1091 = vmatprep.mubr.f32.mxu1 %v797_v18 }
 0x53f   :  { %v2784_v41 = vpop.f32.mrb[46].mxu1 }
 0x540   :  { %v942_v50 = vpop.f32.mrb[47].mxu1 }
 0x541   :  { %1092 = vmatmul.mubr.f32.gmra.mrb[62].mxu1 %v2772_v35 }
 0x542   :  { %1096 = vmatprep.mubr.f32.mxu1 %v798_v5 }
 0x545   :  { %1097 = vmatmul.mubr.f32.gmra.mrb[64].mxu1 %v912_v9 }
 0x546   :  { %1101 = vmatprep.mubr.f32.mxu1 %v799_v16 }
 0x549   :  { %1102 = vmatmul.mubr.f32.gmra.mrb[66].mxu1 %v2775_v61 }
 0x54a   :  { %1106 = vmatprep.mubr.f32.mxu1 %v800_v11 }
 0x54d   :  { %1107 = vmatmul.mubr.f32.gmra.mrb[68].mxu1 %v922_v39 }
 0x54e   :  { %1111 = vmatprep.mubr.f32.mxu1 %v801_v1 }
 0x551   :  { %1112 = vmatmul.mubr.f32.gmra.mrb[70].mxu1 %v2778_v19 }
 0x552   :  { %1116 = vmatprep.mubr.f32.mxu1 %v802_v60 }
 0x555   :  { %1117 = vmatmul.mubr.f32.gmra.mrb[72].mxu1 %v932_v36 }
 0x556   :  { %1121 = vmatprep.mubr.f32.mxu1 %v803_v37 }
 0x559   :  { %1122 = vmatmul.mubr.f32.gmra.mrb[74].mxu1 %v2781_v59 }
 0x55a   :  { %1126 = vmatprep.mubr.f32.mxu1 %v804_v52 }
 0x55d   :  { %1127 = vmatmul.mubr.f32.gmra.mrb[76].mxu1 %v942_v50 }
 0x55e   :  { %1131 = vmatprep.mubr.f32.mxu1 %v4409_v7 }
 0x561   :  { %1132 = vmatmul.mubr.f32.gmra.mrb[78].mxu1 %v2784_v41 }
 0x562   :  { %2873 = vmatprep.mubr.f32.mxu1 %v3345_v12 }
 0x5f8   :  { %v2311_v30 = vpop.f32.mrb[48].mxu1 }
 0x5f9   :  { %v2312_v38 = vpop.f32.mrb[49].mxu1 }
 0x5fa   :  { %v2313_v58 = vadd.f32 %v2312_v38, %v2311_v30 }
 0x5fc   :  { %v2314_v18 = vpop.f32.mrb[50].mxu1  ;;  %v4016_v10 = vadd.f32 %v2313_v58, %v4013_v3 }
 0x5fd   :  { %v2315_v49 = vpop.f32.mrb[51].mxu1 }
 0x5fe   :  { %v2316_v5 = vadd.f32 %v2315_v49, %v2314_v18  ;;  %v1137_v11 = vmax.f32 %v4016_v10, 0.0 }
 0x600   :  { %v4019_v16 = vadd.f32 %v2316_v5, %v4013_v3  ;;  %v2317_v56 = vpop.f32.mrb[52].mxu1 }
 0x601   :  { %v2318_v22 = vpop.f32.mrb[53].mxu1 }
 0x602   :  { %v1138_v1 = vmax.f32 %v4019_v16, 0.0  ;;  %v2319_v57 = vadd.f32 %v2318_v22, %v2317_v56 }
 0x604   :  { %v2320_v48 = vpop.f32.mrb[54].mxu1  ;;  %v3159_v60 = vpack.c.bf16 %v1138_v1, %v1137_v11  ;;  %v4028_v14 = vadd.f32 %v2319_v57, %v4013_v3 }
 0x605   :  { %v2321_v37 = vpop.f32.mrb[55].mxu1 }
 0x606   :  { %v2322_v43 = vadd.f32 %v2321_v37, %v2320_v48  ;;  %3160 = vmatprep.subr.bf16.mxu0 %v3159_v60  ;;  %v1139_v8 = vmax.f32 %v4028_v14, 0.0 }
 0x607   :  { %3162 = vmatpush3.bf16.msra.mxu0 %v3159_v60 }
 0x608   :  { %v4031_v52 = vadd.f32 %v2322_v43, %v4013_v3  ;;  %v2323_v63 = vpop.f32.mrb[56].mxu1 }
 0x609   :  { %v2324_v13 = vpop.f32.mrb[57].mxu1 }
 0x60a   :  { %v1140_v62 = vmax.f32 %v4031_v52, 0.0  ;;  %v2325_v55 = vadd.f32 %v2324_v13, %v2323_v63 }
 0x60c   :  { %v2326_v51 = vpop.f32.mrb[58].mxu1  ;;  %v3163_v17 = vpack.c.bf16 %v1140_v62, %v1139_v8  ;;  %v4040_v21 = vadd.f32 %v2325_v55, %v4013_v3 }
 0x60d   :  { %v2327_v29 = vpop.f32.mrb[59].mxu1 }
 0x60e   :  { %v2328_v15 = vadd.f32 %v2327_v29, %v2326_v51  ;;  %3164 = vmatprep.subr.bf16.mxu0 %v3163_v17  ;;  %v1141_v20 = vmax.f32 %v4040_v21, 0.0 }
 0x60f   :  { %3166 = vmatpush3.bf16.msra.mxu0 %v3163_v17 }
 0x610   :  { %v4043_v53 = vadd.f32 %v2328_v15, %v4013_v3  ;;  %v2329_v0 = vpop.f32.mrb[60].mxu1 }
 0x611   :  { %v2330_v23 = vpop.f32.mrb[61].mxu1 }
 0x612   :  { %v1142_v24 = vmax.f32 %v4043_v53, 0.0  ;;  %v2331_v40 = vadd.f32 %v2330_v23, %v2329_v0 }
 0x614   :  { %v2332_v45 = vpop.f32.mrb[62].mxu1  ;;  %v3167_v2 = vpack.c.bf16 %v1142_v24, %v1141_v20  ;;  %v4052_v54 = vadd.f32 %v2331_v40, %v4013_v3  ;;  %v1315_v40 = vld [vmem:[#allocation7 + $0x380] sm:$0xff] }
 0x615   :  { %v2333_v25 = vpop.f32.mrb[63].mxu1 }
 0x616   :  { %v2334_v26 = vadd.f32 %v2333_v25, %v2332_v45  ;;  %3168 = vmatprep.subr.bf16.mxu0 %v3167_v2  ;;  %v1143_v27 = vmax.f32 %v4052_v54, 0.0  ;;  %v1316_v45 = vld [vmem:[#allocation7 + $0x388] sm:$0xff] }
 0x617   :  { %3170 = vmatpush3.bf16.msra.mxu0 %v3167_v2 }
 0x618   :  { %v4055_v46 = vadd.f32 %v2334_v26, %v4013_v3  ;;  %v2335_v4 = vpop.f32.mrb[64].mxu1 }
 0x619   :  { %v2336_v42 = vpop.f32.mrb[65].mxu1 }
 0x61a   :  { %v1144_v28 = vmax.f32 %v4055_v46, 0.0  ;;  %v2337_v31 = vadd.f32 %v2336_v42, %v2335_v4  ;;  %v3191_v4 = vpack.c.bf16 %v1316_v45, %v1315_v40  ;;  %v1299_v42 = vld [vmem:[#allocation7 + $0x300] sm:$0xff] }
 0x61b   :  { %v4191_v46 = vld [vmem:[%s4398_s3 + $0x3] ss:$0 sm:$0xff] }
 0x61c   :  { %v2338_v32 = vpop.f32.mrb[66].mxu1  ;;  %v3171_v44 = vpack.c.bf16 %v1144_v28, %v1143_v27  ;;  %v4064_v33 = vadd.f32 %v2337_v31, %v4013_v3  ;;  %v1300_v31 = vld [vmem:[#allocation7 + $0x308] sm:$0xff] }
 0x61d   :  { %v2339_v6 = vpop.f32.mrb[67].mxu1 }
 0x61e   :  { %v2340_v34 = vadd.f32 %v2339_v6, %v2338_v32  ;;  %3172 = vmatprep.subr.bf16.mxu0 %v3171_v44  ;;  %v1145_v9 = vmax.f32 %v4064_v33, 0.0  ;;  %v1317_v32 = vld [vmem:[#allocation7 + $0x390] sm:$0xff] }
 0x61f   :  { %3174 = vmatpush3.bf16.msra.mxu0 %v3171_v44  ;;  %v1318_v44 = vld [vmem:[#allocation7 + $0x398] sm:$0xff] }
 0x620   :  { %v4067_v35 = vadd.f32 %v2340_v34, %v4013_v3  ;;  %v2341_v47 = vpop.f32.mrb[68].mxu1  ;;  %v3195_v6 = vpack.c.bf16 %v1318_v44, %v1317_v32  ;;  %v1301_v34 = vld [vmem:[#allocation7 + $0x310] sm:$0xff]  ;;  %v4129_v32 = vld [vmem:[#allocation2 + $0x38] sm:$0xff]  ;;  %v4132_v44 = vld [vmem:[#allocation2 + $0x40] sm:$0xff] }
 0x621   :  { %v2342_v61 = vpop.f32.mrb[69].mxu1 }
 0x622   :  { %v1146_v19 = vmax.f32 %v4067_v35, 0.0  ;;  %v2343_v39 = vadd.f32 %v2342_v61, %v2341_v47  ;;  %v1302_v47 = vld [vmem:[#allocation7 + $0x318] sm:$0xff]  ;;  %v1319_v61 = vld [vmem:[#allocation7 + $0x3a0] sm:$0xff] }
 0x624   :  { %v2344_v59 = vpop.f32.mrb[70].mxu1  ;;  %v3175_v36 = vpack.c.bf16 %v1146_v19, %v1145_v9  ;;  %v4076_v50 = vadd.f32 %v2343_v39, %v4013_v3  ;;  %v1320_v39 = vld [vmem:[#allocation7 + $0x3a8] sm:$0xff] }
 0x625   :  { %v2345_v41 = vpop.f32.mrb[71].mxu1 }
 0x626   :  { %v2346_v7 = vadd.f32 %v2345_v41, %v2344_v59  ;;  %3176 = vmatprep.subr.bf16.mxu0 %v3175_v36  ;;  %v1147_v58 = vmax.f32 %v4076_v50, 0.0  ;;  %v4111_v59 = vld [vmem:[#allocation2 + $0x8] sm:$0xff]  ;;  %v3197_v41 = vpack.c.bf16 %v1302_v47, %v1301_v34  ;;  %v1309_v34 = vld [vmem:[#allocation7 + $0x350] sm:$0xff]  ;;  %v1310_v47 = vld [vmem:[#allocation7 + $0x358] sm:$0xff] }
 0x627   :  { %3178 = vmatpush3.bf16.msra.mxu0 %v3175_v36  ;;  %v4114_v36 = vld [vmem:[#allocation2 + $0x10] sm:$0xff] }
 0x628   :  { %v4079_v12 = vadd.f32 %v2346_v7, %v4013_v3  ;;  %v2347_v30 = vpop.f32.mrb[72].mxu1  ;;  %v3199_v7 = vpack.c.bf16 %v1320_v39, %v1319_v61  ;;  %v1327_v61 = vld [vmem:[#allocation7 + $0x3e0] sm:$0xff]  ;;  %v1328_v39 = vld [vmem:[#allocation7 + $0x3e8] sm:$0xff] }
 0x629   :  { %v2348_v38 = vpop.f32.mrb[73].mxu1 }
 0x62a   :  { %v1148_v18 = vmax.f32 %v4079_v12, 0.0  ;;  %v2349_v49 = vadd.f32 %v2348_v38, %v2347_v30  ;;  %v1303_v30 = vld [vmem:[#allocation7 + $0x320] sm:$0xff]  ;;  %v1304_v38 = vld [vmem:[#allocation7 + $0x328] sm:$0xff] }
 0x62c   :  { %v2350_v5 = vpop.f32.mrb[74].mxu1  ;;  %v3179_v56 = vpack.c.bf16 %v1148_v18, %v1147_v58  ;;  %v4088_v57 = vadd.f32 %v2349_v49, %v4013_v3  ;;  %v1321_v49 = vld [vmem:[#allocation7 + $0x3b0] sm:$0xff] }
 0x62d   :  { %v2351_v22 = vpop.f32.mrb[75].mxu1 }
 0x62e   :  { %v2352_v48 = vadd.f32 %v2351_v22, %v2350_v5  ;;  %3180 = vmatprep.subr.bf16.mxu0 %v3179_v56  ;;  %v1149_v63 = vmax.f32 %v4088_v57, 0.0  ;;  %v1322_v5 = vld [vmem:[#allocation7 + $0x3b8] sm:$0xff]  ;;  %v4120_v22 = vld [vmem:[#allocation2 + $0x20] sm:$0xff] }
 0x62f   :  { %3182 = vmatpush3.bf16.msra.mxu0 %v3179_v56  ;;  %v4117_v56 = vld [vmem:[#allocation2 + $0x18] sm:$0xff] }
 0x630   :  { %v4091_v60 = vadd.f32 %v2352_v48, %v4013_v3  ;;  %v2353_v37 = vpop.f32.mrb[76].mxu1  ;;  %v3201_v48 = vpack.c.bf16 %v1304_v38, %v1303_v30  ;;  %v3213_v30 = vpack.c.bf16 %v1310_v47, %v1309_v34  ;;  %v3215_v38 = vpack.c.bf16 %v1328_v39, %v1327_v61 }
 0x631   :  { %v2354_v43 = vpop.f32.mrb[77].mxu1 }
 0x632   :  { %v1150_v13 = vmax.f32 %v4091_v60, 0.0  ;;  %v2355_v55 = vadd.f32 %v2354_v43, %v2353_v37  ;;  %v3203_v37 = vpack.c.bf16 %v1322_v5, %v1321_v49  ;;  %v1305_v43 = vld [vmem:[#allocation7 + $0x330] sm:$0xff]  ;;  %v1311_v49 = vld [vmem:[#allocation7 + $0x360] sm:$0xff]  ;;  %v1312_v5 = vld [vmem:[#allocation7 + $0x368] sm:$0xff] }
 0x634   :  { %v2356_v51 = vpop.f32.mrb[78].mxu1  ;;  %v3183_v17 = vpack.c.bf16 %v1150_v13, %v1149_v63  ;;  %v4100_v15 = vadd.f32 %v2355_v55, %v4013_v3  ;;  %v1306_v55 = vld [vmem:[#allocation7 + $0x338] sm:$0xff] }
 0x635   :  { %v2357_v29 = vpop.f32.mrb[79].mxu1  ;;  %v3205_v40 = vpack.c.bf16 %v1306_v55, %v1305_v43  ;;  %v4141_v43 = vld [vmem:[#allocation2 + $0x58] sm:$0xff]  ;;  %v4144_v55 = vld [vmem:[#allocation2 + $0x60] sm:$0xff] }
 0x636   :  { %v2358_v0 = vadd.f32 %v2357_v29, %v2356_v51  ;;  %3184 = vmatprep.subr.bf16.mxu0 %v3183_v17  ;;  %v1151_v2 = vmax.f32 %v4100_v15, 0.0  ;;  %v1323_v51 = vld [vmem:[#allocation7 + $0x3c0] sm:$0xff]  ;;  %v4123_v29 = vld [vmem:[#allocation2 + $0x28] sm:$0xff] }
 0x637   :  { %3186 = vmatpush3.bf16.msra.mxu0 %v3183_v17  ;;  %v1324_v17 = vld [vmem:[#allocation7 + $0x3c8] sm:$0xff] }
 0x638   :  { %v4103_v23 = vadd.f32 %v2358_v0, %v4013_v3  ;;  %v3193_v3 = vpack.c.bf16 %v1300_v31, %v1299_v42  ;;  %v4126_v0 = vld [vmem:[#allocation2 + $0x30] sm:$0xff]  ;;  %v3207_v45 = vpack.c.bf16 %v1324_v17, %v1323_v51  ;;  %v1326_v31 = vld [vmem:[#allocation7 + $0x3d8] sm:$0xff]  ;;  %v3217_v51 = vpack.c.bf16 %v1312_v5, %v1311_v49 }
 0x639   :  { %v1325_v42 = vld [vmem:[#allocation7 + $0x3d0] sm:$0xff] }
 0x63a   :  { %v1152_v25 = vmax.f32 %v4103_v23, 0.0 }
 0x63c   :  { %v3187_v26 = vpack.c.bf16 %v1152_v25, %v1151_v2 }
 0x63e   :  { %3188 = vmatprep.subr.bf16.mxu0 %v3187_v26 }
 0x63f   :  { %3190 = vmatpush3.bf16.msra.mxu0 %v3187_v26  ;;  %v1307_v26 = vld [vmem:[#allocation7 + $0x340] sm:$0xff] }
 0x640   :  { %3192 = vmatprep.subr.bf16.mxu0 %v3191_v4  ;;  %v1308_v4 = vld [vmem:[#allocation7 + $0x348] sm:$0xff] }
 0x642   :  { %2818 = vmatmul.mubr.f32.vlgmr.msra.gmra.mrb[64].mxu0 %v4111_v59 }
 0x643   :  { %2820 = vmatprep.mubr.f32.mxu0 %v4114_v36  ;;  %3194 = vmatpush3.bf16.msra.mxu0 %v3193_v3  ;;  %v3209_v3 = vpack.c.bf16 %v1308_v4, %v1307_v26  ;;  %v4147_v26 = vld [vmem:[#allocation2 + $0x68] sm:$0xff]  ;;  %v4150_v4 = vld [vmem:[#allocation2 + $0x70] sm:$0xff] }
 0x644   :  { %3196 = vmatprep.subr.bf16.mxu0 %v3195_v6  ;;  %v3211_v6 = vpack.c.bf16 %v1326_v31, %v1325_v42  ;;  %v4153_v31 = vld [vmem:[#allocation2 + $0x78] sm:$0xff] }
 0x646   :  { %2821 = vmatmul.mubr.f32.gmra.mrb[66].mxu0 %v4117_v56 }
 0x647   :  { %2823 = vmatprep.mubr.f32.mxu0 %v4120_v22  ;;  %3198 = vmatpush3.bf16.msra.mxu0 %v3197_v41  ;;  %v4135_v41 = vld [vmem:[#allocation2 + $0x48] sm:$0xff] }
 0x648   :  { %3200 = vmatprep.subr.bf16.mxu0 %v3199_v7  ;;  %v4138_v7 = vld [vmem:[#allocation2 + $0x50] sm:$0xff] }
 0x64a   :  { %2824 = vmatmul.mubr.f32.gmra.mrb[68].mxu0 %v4123_v29 }
 0x64b   :  { %2826 = vmatprep.mubr.f32.mxu0 %v4126_v0  ;;  %3202 = vmatpush3.bf16.msra.mxu0 %v3201_v48  ;;  %v1329_v48 = vld [vmem:[#allocation7 + $0x3f0] sm:$0xff] }
 0x64c   :  { %3204 = vmatprep.subr.bf16.mxu0 %v3203_v37  ;;  %v1330_v37 = vld [vmem:[#allocation7 + $0x3f8] sm:$0xff] }
 0x64d   :  { %v3219_v17 = vpack.c.bf16 %v1330_v37, %v1329_v48 }
 0x64e   :  { %2827 = vmatmul.mubr.f32.gmra.mrb[70].mxu0 %v4129_v32 }
 0x64f   :  { %2829 = vmatprep.mubr.f32.mxu0 %v4132_v44  ;;  %3206 = vmatpush3.bf16.msra.mxu0 %v3205_v40  ;;  %v1313_v40 = vld [vmem:[#allocation7 + $0x370] sm:$0xff] }
 0x650   :  { %3208 = vmatprep.subr.bf16.mxu0 %v3207_v45  ;;  %v1314_v45 = vld [vmem:[#allocation7 + $0x378] sm:$0xff] }
 0x651   :  { %v3221_v42 = vpack.c.bf16 %v1314_v45, %v1313_v40 }
 0x652   :  { %2830 = vmatmul.mubr.f32.gmra.mrb[72].mxu0 %v4135_v41 }
 0x653   :  { %2832 = vmatprep.mubr.f32.mxu0 %v4138_v7  ;;  %3210 = vmatpush3.bf16.msra.mxu0 %v3209_v3 }
 0x654   :  { %3212 = vmatprep.subr.bf16.mxu0 %v3211_v6 }
 0x656   :  { %2833 = vmatmul.mubr.f32.gmra.mrb[74].mxu0 %v4141_v43 }
 0x657   :  { %2835 = vmatprep.mubr.f32.mxu0 %v4144_v55  ;;  %3214 = vmatpush3.bf16.msra.mxu0 %v3213_v30 }
 0x658   :  { %3216 = vmatprep.subr.bf16.mxu0 %v3215_v38 }
 0x65a   :  { %2836 = vmatmul.mubr.f32.gmra.mrb[76].mxu0 %v4147_v26 }
 0x65b   :  { %2838 = vmatprep.mubr.f32.mxu0 %v4150_v4  ;;  %3218 = vmatpush3.bf16.msra.mxu0 %v3217_v51 }
 0x65c   :  { %3220 = vmatprep.subr.bf16.mxu0 %v3219_v17 }
 0x65e   :  { %2839 = vmatmul.mubr.f32.gmra.mrb[78].mxu0 %v4153_v31 }
 0x65f   :  { %1403 = vmatprep.mubr.f32.mxu0 %v1137_v11  ;;  %3222 = vmatpush3.bf16.msra.mxu0 %v3221_v42 }
 0x715   :  { %v2819_v3 = vpop.f32.mrb[64].mxu0 }
 0x716   :  { %v1219_v6 = vpop.f32.mrb[65].mxu0 }
 0x717   :  { %1404 = vmatmul.mubr.f32.vlgmr.msra.gmra.mrb[80].mxu0 %v1219_v6 }
 0x718   :  { %1408 = vmatprep.mubr.f32.mxu0 %v1138_v1 }
 0x719   :  { %v2822_v34 = vpop.f32.mrb[66].mxu0 }
 0x71a   :  { %v1229_v47 = vpop.f32.mrb[67].mxu0 }
 0x71b   :  { %1409 = vmatmul.mubr.f32.gmra.mrb[82].mxu0 %v2819_v3 }
 0x71c   :  { %1413 = vmatprep.mubr.f32.mxu0 %v1139_v8 }
 0x71d   :  { %v2825_v61 = vpop.f32.mrb[68].mxu0 }
 0x71e   :  { %v1239_v39 = vpop.f32.mrb[69].mxu0 }
 0x71f   :  { %1414 = vmatmul.mubr.f32.gmra.mrb[84].mxu0 %v1229_v47 }
 0x720   :  { %1418 = vmatprep.mubr.f32.mxu0 %v1140_v62 }
 0x721   :  { %v2828_v10 = vpop.f32.mrb[70].mxu0 }
 0x722   :  { %v1249_v11 = vpop.f32.mrb[71].mxu0 }
 0x723   :  { %1419 = vmatmul.mubr.f32.gmra.mrb[86].mxu0 %v2822_v34 }
 0x724   :  { %1423 = vmatprep.mubr.f32.mxu0 %v1141_v20 }
 0x725   :  { %v2831_v16 = vpop.f32.mrb[72].mxu0 }
 0x726   :  { %v1259_v1 = vpop.f32.mrb[73].mxu0 }
 0x727   :  { %1424 = vmatmul.mubr.f32.gmra.mrb[88].mxu0 %v1239_v39 }
 0x728   :  { %1428 = vmatprep.mubr.f32.mxu0 %v1142_v24 }
 0x729   :  { %v2834_v14 = vpop.f32.mrb[74].mxu0 }
 0x72a   :  { %v1269_v8 = vpop.f32.mrb[75].mxu0 }
 0x72b   :  { %1429 = vmatmul.mubr.f32.gmra.mrb[90].mxu0 %v2825_v61 }
 0x72c   :  { %1433 = vmatprep.mubr.f32.mxu0 %v1143_v27 }
 0x72d   :  { %v2837_v52 = vpop.f32.mrb[76].mxu0 }
 0x72e   :  { %v1279_v62 = vpop.f32.mrb[77].mxu0 }
 0x72f   :  { %1434 = vmatmul.mubr.f32.gmra.mrb[92].mxu0 %v1249_v11 }
 0x730   :  { %1438 = vmatprep.mubr.f32.mxu0 %v1144_v28 }
 0x731   :  { %v2840_v21 = vpop.f32.mrb[78].mxu0 }
 0x732   :  { %v1289_v20 = vpop.f32.mrb[79].mxu0 }
 0x733   :  { %1439 = vmatmul.mubr.f32.gmra.mrb[94].mxu0 %v2828_v10 }
 0x734   :  { %1443 = vmatprep.mubr.f32.mxu0 %v1145_v9 }
 0x737   :  { %1444 = vmatmul.mubr.f32.gmra.mrb[96].mxu0 %v1259_v1 }
 0x738   :  { %1448 = vmatprep.mubr.f32.mxu0 %v1146_v19 }
 0x73b   :  { %1449 = vmatmul.mubr.f32.gmra.mrb[98].mxu0 %v2831_v16 }
 0x73c   :  { %1453 = vmatprep.mubr.f32.mxu0 %v1147_v58 }
 0x73f   :  { %1454 = vmatmul.mubr.f32.gmra.mrb[100].mxu0 %v1269_v8 }
 0x740   :  { %1458 = vmatprep.mubr.f32.mxu0 %v1148_v18 }
 0x743   :  { %1459 = vmatmul.mubr.f32.gmra.mrb[102].mxu0 %v2834_v14 }
 0x744   :  { %1463 = vmatprep.mubr.f32.mxu0 %v1149_v63 }
 0x747   :  { %1464 = vmatmul.mubr.f32.gmra.mrb[104].mxu0 %v1279_v62 }
 0x748   :  { %1468 = vmatprep.mubr.f32.mxu0 %v1150_v13 }
 0x74b   :  { %1469 = vmatmul.mubr.f32.gmra.mrb[106].mxu0 %v2837_v52 }
 0x74c   :  { %1473 = vmatprep.mubr.f32.mxu0 %v1151_v2 }
 0x74f   :  { %1474 = vmatmul.mubr.f32.gmra.mrb[108].mxu0 %v1289_v20 }
 0x750   :  { %1478 = vmatprep.mubr.f32.mxu0 %v1152_v25 }
 0x753   :  { %1479 = vmatmul.mubr.f32.gmra.mrb[110].mxu0 %v2840_v21 }
 0x7ea   :  { %v2423_v53 = vpop.f32.mrb[80].mxu0 }
 0x7eb   :  { %v2424_v24 = vpop.f32.mrb[81].mxu0 }
 0x7ec   :  { %v2425_v54 = vadd.f32 %v2424_v24, %v2423_v53 }
 0x7ee   :  { %v2426_v27 = vpop.f32.mrb[82].mxu0  ;;  %v4194_v33 = vadd.f32 %v2425_v54, %v4191_v46 }
 0x7ef   :  { %v2427_v28 = vpop.f32.mrb[83].mxu0 }
 0x7f0   :  { %v2428_v35 = vadd.f32 %v2427_v28, %v2426_v27  ;;  %v1484_v12 = vmax.f32 %v4194_v33, 0.0 }
 0x7f2   :  { %v4197_v9 = vadd.f32 %v2428_v35, %v4191_v46  ;;  %v2429_v19 = vpop.f32.mrb[84].mxu0 }
 0x7f3   :  { %v2430_v50 = vpop.f32.mrb[85].mxu0 }
 0x7f4   :  { %v1485_v58 = vmax.f32 %v4197_v9, 0.0  ;;  %v2431_v18 = vadd.f32 %v2430_v50, %v2429_v19 }
 0x7f6   :  { %v2432_v57 = vpop.f32.mrb[86].mxu0  ;;  %v3223_v60 = vpack.c.bf16 %v1485_v58, %v1484_v12  ;;  %v4206_v13 = vadd.f32 %v2431_v18, %v4191_v46 }
 0x7f7   :  { %v2433_v63 = vpop.f32.mrb[87].mxu0 }
 0x7f8   :  { %v2434_v15 = vadd.f32 %v2433_v63, %v2432_v57  ;;  %3224 = vmatprep.subr.bf16.mxu1 %v3223_v60  ;;  %v1486_v30 = vmax.f32 %v4206_v13, 0.0 }
 0x7f9   :  { %3226 = vmatpush3.bf16.msra.mxu1 %v3223_v60 }
 0x7fa   :  { %v4209_v23 = vadd.f32 %v2434_v15, %v4191_v46  ;;  %v2435_v2 = vpop.f32.mrb[88].mxu0 }
 0x7fb   :  { %v2436_v25 = vpop.f32.mrb[89].mxu0 }
 0x7fc   :  { %v1487_v38 = vmax.f32 %v4209_v23, 0.0  ;;  %v2437_v49 = vadd.f32 %v2436_v25, %v2435_v2 }
 0x7fe   :  { %v2438_v5 = vpop.f32.mrb[90].mxu0  ;;  %v3227_v48 = vpack.c.bf16 %v1487_v38, %v1486_v30  ;;  %v4218_v51 = vadd.f32 %v2437_v49, %v4191_v46 }
 0x7ff   :  { %v2439_v37 = vpop.f32.mrb[91].mxu0 }
 0x800   :  { %v2440_v17 = vadd.f32 %v2439_v37, %v2438_v5  ;;  %3228 = vmatprep.subr.bf16.mxu1 %v3227_v48  ;;  %v1488_v3 = vmax.f32 %v4218_v51, 0.0 }
 0x801   :  { %3230 = vmatpush3.bf16.msra.mxu1 %v3227_v48 }
 0x802   :  { %v4221_v40 = vadd.f32 %v2440_v17, %v4191_v46  ;;  %v2441_v45 = vpop.f32.mrb[92].mxu0 }
 0x803   :  { %v2442_v42 = vpop.f32.mrb[93].mxu0 }
 0x804   :  { %v1489_v6 = vmax.f32 %v4221_v40, 0.0  ;;  %v2443_v34 = vadd.f32 %v2442_v42, %v2441_v45 }
 0x806   :  { %v2444_v47 = vpop.f32.mrb[94].mxu0  ;;  %v3231_v61 = vpack.c.bf16 %v1489_v6, %v1488_v3  ;;  %v4230_v10 = vadd.f32 %v2443_v34, %v4191_v46 }
 0x807   :  { %v2445_v39 = vpop.f32.mrb[95].mxu0 }
 0x808   :  { %v2446_v11 = vadd.f32 %v2445_v39, %v2444_v47  ;;  %3232 = vmatprep.subr.bf16.mxu1 %v3231_v61  ;;  %v1490_v8 = vmax.f32 %v4230_v10, 0.0 }
 0x809   :  { %3234 = vmatpush3.bf16.msra.mxu1 %v3231_v61 }
 0x80a   :  { %v4233_v16 = vadd.f32 %v2446_v11, %v4191_v46  ;;  %v2447_v1 = vpop.f32.mrb[96].mxu0 }
 0x80b   :  { %v2448_v14 = vpop.f32.mrb[97].mxu0 }
 0x80c   :  { %v1491_v52 = vmax.f32 %v4233_v16, 0.0  ;;  %v2449_v62 = vadd.f32 %v2448_v14, %v2447_v1 }
 0x80e   :  { %v2450_v21 = vpop.f32.mrb[98].mxu0  ;;  %v3235_v20 = vpack.c.bf16 %v1491_v52, %v1490_v8  ;;  %v4242_v24 = vadd.f32 %v2449_v62, %v4191_v46 }
 0x80f   :  { %v2451_v53 = vpop.f32.mrb[99].mxu0 }
 0x810   :  { %v2452_v54 = vadd.f32 %v2451_v53, %v2450_v21  ;;  %3236 = vmatprep.subr.bf16.mxu1 %v3235_v20  ;;  %v1492_v19 = vmax.f32 %v4242_v24, 0.0  ;;  %v4342_v24 = vld [vmem:[%s4398_s3 + $0x4] ss:$0 sm:$0xff] }
 0x811   :  { %3238 = vmatpush3.bf16.msra.mxu1 %v3235_v20 }
 0x812   :  { %v4245_v27 = vadd.f32 %v2452_v54, %v4191_v46  ;;  %v2453_v28 = vpop.f32.mrb[100].mxu0 }
 0x813   :  { %v2454_v35 = vpop.f32.mrb[101].mxu0 }
 0x814   :  { %v1493_v50 = vmax.f32 %v4245_v27, 0.0  ;;  %v2455_v18 = vadd.f32 %v2454_v35, %v2453_v28 }
 0x816   :  { %v2456_v57 = vpop.f32.mrb[102].mxu0  ;;  %v3239_v60 = vpack.c.bf16 %v1493_v50, %v1492_v19  ;;  %v4254_v15 = vadd.f32 %v2455_v18, %v4191_v46 }
 0x817   :  { %v2457_v63 = vpop.f32.mrb[103].mxu0 }
 0x818   :  { %v2458_v2 = vadd.f32 %v2457_v63, %v2456_v57  ;;  %3240 = vmatprep.subr.bf16.mxu1 %v3239_v60  ;;  %v1494_v48 = vmax.f32 %v4254_v15, 0.0  ;;  %v1662_v57 = vld [vmem:[#allocation7 + $0x480] sm:$0xff] }
 0x819   :  { %3242 = vmatpush3.bf16.msra.mxu1 %v3239_v60  ;;  %v1663_v60 = vld [vmem:[#allocation7 + $0x488] sm:$0xff] }
 0x81a   :  { %v4257_v25 = vadd.f32 %v2458_v2, %v4191_v46  ;;  %v2459_v49 = vpop.f32.mrb[104].mxu0 }
 0x81b   :  { %v2460_v5 = vpop.f32.mrb[105].mxu0 }
 0x81c   :  { %v1495_v37 = vmax.f32 %v4257_v25, 0.0  ;;  %v2461_v17 = vadd.f32 %v2460_v5, %v2459_v49  ;;  %v3255_v5 = vpack.c.bf16 %v1663_v60, %v1662_v57  ;;  %v1651_v57 = vld [vmem:[#allocation7 + $0x428] sm:$0xff]  ;;  %v1668_v60 = vld [vmem:[#allocation7 + $0x4b0] sm:$0xff] }
 0x81e   :  { %v2462_v45 = vpop.f32.mrb[106].mxu0  ;;  %v3243_v42 = vpack.c.bf16 %v1495_v37, %v1494_v48  ;;  %v4266_v47 = vadd.f32 %v2461_v17, %v4191_v46  ;;  %v1646_v17 = vld [vmem:[#allocation7 + $0x400] sm:$0xff] }
 0x81f   :  { %v2463_v34 = vpop.f32.mrb[107].mxu0 }
 0x820   :  { %v2464_v61 = vadd.f32 %v2463_v34, %v2462_v45  ;;  %3244 = vmatprep.subr.bf16.mxu1 %v3243_v42  ;;  %v1496_v14 = vmax.f32 %v4266_v47, 0.0  ;;  %v1647_v45 = vld [vmem:[#allocation7 + $0x408] sm:$0xff]  ;;  %v1665_v34 = vld [vmem:[#allocation7 + $0x498] sm:$0xff] }
 0x821   :  { %3246 = vmatpush3.bf16.msra.mxu1 %v3243_v42  ;;  %v1664_v42 = vld [vmem:[#allocation7 + $0x490] sm:$0xff] }
 0x822   :  { %v4269_v39 = vadd.f32 %v2464_v61, %v4191_v46  ;;  %v2465_v11 = vpop.f32.mrb[108].mxu0  ;;  %v3259_v61 = vpack.c.bf16 %v1665_v34, %v1664_v42 }
 0x823   :  { %v2466_v1 = vpop.f32.mrb[109].mxu0 }
 0x824   :  { %v1497_v62 = vmax.f32 %v4269_v39, 0.0  ;;  %v2467_v21 = vadd.f32 %v2466_v1, %v2465_v11  ;;  %v1648_v11 = vld [vmem:[#allocation7 + $0x410] sm:$0xff]  ;;  %v1649_v1 = vld [vmem:[#allocation7 + $0x418] sm:$0xff] }
 0x826   :  { %v2468_v20 = vpop.f32.mrb[110].mxu0  ;;  %v3247_v53 = vpack.c.bf16 %v1497_v62, %v1496_v14  ;;  %v4278_v28 = vadd.f32 %v2467_v21, %v4191_v46  ;;  %v1666_v21 = vld [vmem:[#allocation7 + $0x4a0] sm:$0xff] }
 0x827   :  { %v2469_v54 = vpop.f32.mrb[111].mxu0 }
 0x828   :  { %v2470_v35 = vadd.f32 %v2469_v54, %v2468_v20  ;;  %3248 = vmatprep.subr.bf16.mxu1 %v3247_v53  ;;  %v1498_v63 = vmax.f32 %v4278_v28, 0.0  ;;  %v1667_v20 = vld [vmem:[#allocation7 + $0x4a8] sm:$0xff] }
 0x829   :  { %3250 = vmatpush3.bf16.msra.mxu1 %v3247_v53  ;;  %v3261_v53 = vpack.c.bf16 %v1649_v1, %v1648_v11  ;;  %v3263_v54 = vpack.c.bf16 %v1667_v20, %v1666_v21  ;;  %v1656_v1 = vld [vmem:[#allocation7 + $0x450] sm:$0xff]  ;;  %v1674_v21 = vld [vmem:[#allocation7 + $0x4e0] sm:$0xff] }
 0x82a   :  { %v4281_v18 = vadd.f32 %v2470_v35, %v4191_v46  ;;  %v3257_v46 = vpack.c.bf16 %v1647_v45, %v1646_v17  ;;  %v1650_v35 = vld [vmem:[#allocation7 + $0x420] sm:$0xff]  ;;  %v1652_v17 = vld [vmem:[#allocation7 + $0x430] sm:$0xff] }
 0x82b   :  { %v1670_v45 = vld [vmem:[#allocation7 + $0x4c0] sm:$0xff] }
 0x82c   :  { %v4406_v2 = vmax.f32 %v4281_v18, 0.0  ;;  %v4410_v40 = vmax.f32 %v4281_v18, 0.0 }
 0x82e   :  { %v3251_v49 = vpack.c.bf16 %v4406_v2, %v1498_v63  ;;  %v1669_v2 = vld [vmem:[#allocation7 + $0x4b8] sm:$0xff] }
 0x830   :  { %3252 = vmatprep.subr.bf16.mxu1 %v3251_v49 }
 0x831   :  { %3254 = vmatpush3.bf16.msra.mxu1 %v3251_v49  ;;  %v3265_v49 = vpack.c.bf16 %v1651_v57, %v1650_v35  ;;  %v1676_v35 = vld [vmem:[#allocation7 + $0x4f0] sm:$0xff] }
 0x832   :  { %3256 = vmatprep.subr.bf16.mxu1 %v3255_v5  ;;  %v3267_v5 = vpack.c.bf16 %v1669_v2, %v1668_v60 }
 0x834   :  { %2874 = vmatmul.mubr.f32.vlgmr.msra.gmra.mrb[80].mxu1 %v4111_v59  ;;  %v1653_v59 = vld [vmem:[#allocation7 + $0x438] sm:$0xff] }
 0x835   :  { %2876 = vmatprep.mubr.f32.mxu1 %v4114_v36  ;;  %3258 = vmatpush3.bf16.msra.mxu1 %v3257_v46  ;;  %v1671_v36 = vld [vmem:[#allocation7 + $0x4c8] sm:$0xff]  ;;  %v3269_v42 = vpack.c.bf16 %v1653_v59, %v1652_v17  ;;  %v1654_v46 = vld [vmem:[#allocation7 + $0x440] sm:$0xff] }
 0x836   :  { %3260 = vmatprep.subr.bf16.mxu1 %v3259_v61  ;;  %v3271_v34 = vpack.c.bf16 %v1671_v36, %v1670_v45  ;;  %v1672_v61 = vld [vmem:[#allocation7 + $0x4d0] sm:$0xff] }
 0x838   :  { %2877 = vmatmul.mubr.f32.gmra.mrb[82].mxu1 %v4117_v56  ;;  %v1655_v56 = vld [vmem:[#allocation7 + $0x448] sm:$0xff] }
 0x839   :  { %2879 = vmatprep.mubr.f32.mxu1 %v4120_v22  ;;  %3262 = vmatpush3.bf16.msra.mxu1 %v3261_v53  ;;  %v1673_v22 = vld [vmem:[#allocation7 + $0x4d8] sm:$0xff]  ;;  %v3273_v2 = vpack.c.bf16 %v1655_v56, %v1654_v46 }
 0x83a   :  { %3264 = vmatprep.subr.bf16.mxu1 %v3263_v54  ;;  %v3275_v11 = vpack.c.bf16 %v1673_v22, %v1672_v61  ;;  %v1658_v54 = vld [vmem:[#allocation7 + $0x460] sm:$0xff] }
 0x83c   :  { %2880 = vmatmul.mubr.f32.gmra.mrb[84].mxu1 %v4123_v29  ;;  %v1657_v29 = vld [vmem:[#allocation7 + $0x458] sm:$0xff] }
 0x83d   :  { %2882 = vmatprep.mubr.f32.mxu1 %v4126_v0  ;;  %3266 = vmatpush3.bf16.msra.mxu1 %v3265_v49  ;;  %v1675_v0 = vld [vmem:[#allocation7 + $0x4e8] sm:$0xff]  ;;  %v3277_v20 = vpack.c.bf16 %v1657_v29, %v1656_v1  ;;  %v1660_v49 = vld [vmem:[#allocation7 + $0x470] sm:$0xff] }
 0x83e   :  { %3268 = vmatprep.subr.bf16.mxu1 %v3267_v5  ;;  %v3279_v53 = vpack.c.bf16 %v1675_v0, %v1674_v21 }
 0x840   :  { %2883 = vmatmul.mubr.f32.gmra.mrb[86].mxu1 %v4129_v32  ;;  %v1659_v32 = vld [vmem:[#allocation7 + $0x468] sm:$0xff] }
 0x841   :  { %2885 = vmatprep.mubr.f32.mxu1 %v4132_v44  ;;  %3270 = vmatpush3.bf16.msra.mxu1 %v3269_v42  ;;  %v1677_v44 = vld [vmem:[#allocation7 + $0x4f8] sm:$0xff]  ;;  %v3281_v57 = vpack.c.bf16 %v1659_v32, %v1658_v54 }
 0x842   :  { %3272 = vmatprep.subr.bf16.mxu1 %v3271_v34  ;;  %v3283_v60 = vpack.c.bf16 %v1677_v44, %v1676_v35 }
 0x844   :  { %2886 = vmatmul.mubr.f32.gmra.mrb[88].mxu1 %v4135_v41  ;;  %v1661_v41 = vld [vmem:[#allocation7 + $0x478] sm:$0xff] }
 0x845   :  { %2888 = vmatprep.mubr.f32.mxu1 %v4138_v7  ;;  %3274 = vmatpush3.bf16.msra.mxu1 %v3273_v2  ;;  %v3285_v7 = vpack.c.bf16 %v1661_v41, %v1660_v49 }
 0x846   :  { %3276 = vmatprep.subr.bf16.mxu1 %v3275_v11 }
 0x848   :  { %2889 = vmatmul.mubr.f32.gmra.mrb[90].mxu1 %v4141_v43 }
 0x849   :  { %2891 = vmatprep.mubr.f32.mxu1 %v4144_v55  ;;  %3278 = vmatpush3.bf16.msra.mxu1 %v3277_v20 }
 0x84a   :  { %3280 = vmatprep.subr.bf16.mxu1 %v3279_v53 }
 0x84c   :  { %2892 = vmatmul.mubr.f32.gmra.mrb[92].mxu1 %v4147_v26 }
 0x84d   :  { %2894 = vmatprep.mubr.f32.mxu1 %v4150_v4  ;;  %3282 = vmatpush3.bf16.msra.mxu1 %v3281_v57 }
 0x84e   :  { %3284 = vmatprep.subr.bf16.mxu1 %v3283_v60 }
 0x850   :  { %2895 = vmatmul.mubr.f32.gmra.mrb[94].mxu1 %v4153_v31 }
 0x851   :  { %1750 = vmatprep.mubr.f32.mxu1 %v1484_v12  ;;  %3286 = vmatpush3.bf16.msra.mxu1 %v3285_v7 }
 0x907   :  { %v2875_v43 = vpop.f32.mrb[80].mxu1 }
 0x908   :  { %v1566_v55 = vpop.f32.mrb[81].mxu1 }
 0x909   :  { %1751 = vmatmul.mubr.f32.vlgmr.msra.gmra.mrb[96].mxu1 %v1566_v55 }
 0x90a   :  { %1755 = vmatprep.mubr.f32.mxu1 %v1485_v58 }
 0x90b   :  { %v2878_v5 = vpop.f32.mrb[82].mxu1 }
 0x90c   :  { %v1576_v17 = vpop.f32.mrb[83].mxu1 }
 0x90d   :  { %1756 = vmatmul.mubr.f32.gmra.mrb[98].mxu1 %v2875_v43 }
 0x90e   :  { %1760 = vmatprep.mubr.f32.mxu1 %v1486_v30 }
 0x90f   :  { %v2881_v26 = vpop.f32.mrb[84].mxu1 }
 0x910   :  { %v1586_v4 = vpop.f32.mrb[85].mxu1 }
 0x911   :  { %1761 = vmatmul.mubr.f32.gmra.mrb[100].mxu1 %v1576_v17 }
 0x912   :  { %1765 = vmatprep.mubr.f32.mxu1 %v1487_v38 }
 0x913   :  { %v2884_v31 = vpop.f32.mrb[86].mxu1 }
 0x914   :  { %v1596_v33 = vpop.f32.mrb[87].mxu1 }
 0x915   :  { %1766 = vmatmul.mubr.f32.gmra.mrb[102].mxu1 %v2878_v5 }
 0x916   :  { %1770 = vmatprep.mubr.f32.mxu1 %v1488_v3  ;;  %v3485_v3 = vmov 0.0|0.0  }
 0x917   :  { %v2887_v9 = vpop.f32.mrb[88].mxu1  ;;  %3287 = vmatprep.subr.bf16.mxu0 %v3485_v3 }
 0x918   :  { %v1606_v12 = vpop.f32.mrb[89].mxu1 }
 0x919   :  { %1771 = vmatmul.mubr.f32.gmra.mrb[104].mxu1 %v1586_v4 }
 0x91a   :  { %1775 = vmatprep.mubr.f32.mxu1 %v1489_v6  ;;  %v3487_v6 = vmov 0.0  }
 0x91b   :  { %v2890_v58 = vpop.f32.mrb[90].mxu1  ;;  %2929 = vmatprep.mubr.msk.f32.mxu0 %vm3486_vm0, %v3487_v6 }
 0x91c   :  { %v1616_v13 = vpop.f32.mrb[91].mxu1 }
 0x91d   :  { %1776 = vmatmul.mubr.f32.gmra.mrb[106].mxu1 %v2881_v26 }
 0x91e   :  { %1780 = vmatprep.mubr.f32.mxu1 %v1490_v8 }
 0x91f   :  { %v2893_v23 = vpop.f32.mrb[92].mxu1 }
 0x920   :  { %v1626_v30 = vpop.f32.mrb[93].mxu1 }
 0x921   :  { %1781 = vmatmul.mubr.f32.gmra.mrb[108].mxu1 %v1596_v33 }
 0x922   :  { %1785 = vmatprep.mubr.f32.mxu1 %v1491_v52 }
 0x923   :  { %v2896_v38 = vpop.f32.mrb[94].mxu1 }
 0x924   :  { %v1636_v51 = vpop.f32.mrb[95].mxu1 }
 0x925   :  { %1786 = vmatmul.mubr.f32.gmra.mrb[110].mxu1 %v2884_v31 }
 0x926   :  { %1790 = vmatprep.mubr.f32.mxu1 %v1492_v19 }
 0x929   :  { %1791 = vmatmul.mubr.f32.gmra.mrb[112].mxu1 %v1606_v12 }
 0x92a   :  { %1795 = vmatprep.mubr.f32.mxu1 %v1493_v50 }
 0x92d   :  { %1796 = vmatmul.mubr.f32.gmra.mrb[114].mxu1 %v2887_v9 }
 0x92e   :  { %1800 = vmatprep.mubr.f32.mxu1 %v1494_v48 }
 0x931   :  { %1801 = vmatmul.mubr.f32.gmra.mrb[116].mxu1 %v1616_v13 }
 0x932   :  { %1805 = vmatprep.mubr.f32.mxu1 %v1495_v37 }
 0x935   :  { %1806 = vmatmul.mubr.f32.gmra.mrb[118].mxu1 %v2890_v58 }
 0x936   :  { %1810 = vmatprep.mubr.f32.mxu1 %v1496_v14 }
 0x939   :  { %1811 = vmatmul.mubr.f32.gmra.mrb[120].mxu1 %v1626_v30 }
 0x93a   :  { %1815 = vmatprep.mubr.f32.mxu1 %v1497_v62 }
 0x93d   :  { %1816 = vmatmul.mubr.f32.gmra.mrb[122].mxu1 %v2893_v23 }
 0x93e   :  { %1820 = vmatprep.mubr.f32.mxu1 %v1498_v63 }
 0x941   :  { %1821 = vmatmul.mubr.f32.gmra.mrb[124].mxu1 %v1636_v51 }
 0x942   :  { %1825 = vmatprep.mubr.f32.mxu1 %v4410_v40 }
 0x945   :  { %1826 = vmatmul.mubr.f32.gmra.mrb[126].mxu1 %v2896_v38 }
 0x9dc   :  { %v2535_v10 = vpop.f32.mrb[96].mxu1 }
 0x9dd   :  { %v2536_v16 = vpop.f32.mrb[97].mxu1 }
 0x9de   :  { %v2537_v8 = vadd.f32 %v2536_v16, %v2535_v10 }
 0x9e0   :  { %v2538_v52 = vpop.f32.mrb[98].mxu1  ;;  %v1753_v50 = vadd.f32 %v2537_v8, %v4342_v24 }
 0x9e1   :  { %v2539_v27 = vpop.f32.mrb[99].mxu1 }
 0x9e2   :  { %v2540_v19 = vadd.f32 %v2539_v27, %v2538_v52 }
 0x9e4   :  { %v1758_v15 = vadd.f32 %v2540_v19, %v4342_v24  ;;  %v2541_v25 = vpop.f32.mrb[100].mxu1 }
 0x9e5   :  { %v2542_v48 = vpop.f32.mrb[101].mxu1 }
 0x9e6   :  { %v3288_v37 = vpack.c.bf16 %v1758_v15, %v1753_v50  ;;  %v2543_v47 = vadd.f32 %v2542_v48, %v2541_v25 }
 0x9e8   :  { %v2544_v39 = vpop.f32.mrb[102].mxu1  ;;  %3289 = vmatpush3.bf16.msra.mxu0 %v3288_v37  ;;  %v1763_v28 = vadd.f32 %v2543_v47, %v4342_v24  ;;  %v1902_v37 = vld [vmem:[#allocation8] sm:$0xff]  ;;  %v1903_v47 = vld [vmem:[#allocation8 + $0x8] sm:$0xff] }
 0x9e9   :  { %v2545_v14 = vpop.f32.mrb[103].mxu1  ;;  %3290 = vmatprep.subr.bf16.mxu0 %v3485_v3 }
 0x9ea   :  { %v2546_v62 = vadd.f32 %v2545_v14, %v2544_v39  ;;  %v1831_v14 = vld [vmem:[%s4399_s4] sm:$0xff] }
 0x9ec   :  { %v1768_v18 = vadd.f32 %v2546_v62, %v4342_v24  ;;  %v2547_v63 = vpop.f32.mrb[104].mxu1  ;;  %v3312_v62 = vpack.c.bf16 %v1903_v47, %v1902_v37 }
 0x9ed   :  { %v2548_v59 = vpop.f32.mrb[105].mxu1 }
 0x9ee   :  { %v3291_v45 = vpack.c.bf16 %v1768_v18, %v1763_v28  ;;  %v2549_v36 = vadd.f32 %v2548_v59, %v2547_v63  ;;  %v1904_v28 = vld [vmem:[#allocation8 + $0x10] sm:$0xff]  ;;  %v1905_v18 = vld [vmem:[#allocation8 + $0x18] sm:$0xff]  ;;  %v1907_v59 = vld [vmem:[#allocation8 + $0x28] sm:$0xff] }
 0x9ef   :  { %v3315_v63 = vpack.c.bf16 %v1905_v18, %v1904_v28 }
 0x9f0   :  { %v2550_v42 = vpop.f32.mrb[106].mxu1  ;;  %3292 = vmatpush3.bf16.msra.mxu0 %v3291_v45  ;;  %v1773_v56 = vadd.f32 %v2549_v36, %v4342_v24  ;;  %v1908_v36 = vld [vmem:[#allocation8 + $0x30] sm:$0xff] }
 0x9f1   :  { %v2551_v34 = vpop.f32.mrb[107].mxu1  ;;  %3293 = vmatprep.subr.bf16.mxu0 %v3485_v3 }
 0x9f2   :  { %v2552_v46 = vadd.f32 %v2551_v34, %v2550_v42  ;;  %v1909_v42 = vld [vmem:[#allocation8 + $0x38] sm:$0xff] }
 0x9f3   :  { %v3321_v34 = vpack.c.bf16 %v1909_v42, %v1908_v36 }
 0x9f4   :  { %v1778_v61 = vadd.f32 %v2552_v46, %v4342_v24  ;;  %v2553_v22 = vpop.f32.mrb[108].mxu1  ;;  %v1910_v46 = vld [vmem:[#allocation8 + $0x40] sm:$0xff] }
 0x9f5   :  { %v2554_v2 = vpop.f32.mrb[109].mxu1 }
 0x9f6   :  { %v3294_v11 = vpack.c.bf16 %v1778_v61, %v1773_v56  ;;  %v2555_v1 = vadd.f32 %v2554_v2, %v2553_v22  ;;  %v1911_v56 = vld [vmem:[#allocation8 + $0x48] sm:$0xff]  ;;  %v1913_v22 = vld [vmem:[#allocation8 + $0x58] sm:$0xff] }
 0x9f7   :  { %v3324_v61 = vpack.c.bf16 %v1911_v56, %v1910_v46 }
 0x9f8   :  { %v2556_v29 = vpop.f32.mrb[110].mxu1  ;;  %3295 = vmatpush3.bf16.msra.mxu0 %v3294_v11  ;;  %v1783_v20 = vadd.f32 %v2555_v1, %v4342_v24  ;;  %v1914_v11 = vld [vmem:[#allocation8 + $0x60] sm:$0xff]  ;;  %v1915_v1 = vld [vmem:[#allocation8 + $0x68] sm:$0xff] }
 0x9f9   :  { %v2557_v21 = vpop.f32.mrb[111].mxu1  ;;  %3296 = vmatprep.subr.bf16.mxu0 %v3485_v3 }
 0x9fa   :  { %v2558_v0 = vadd.f32 %v2557_v21, %v2556_v29  ;;  %v3330_v29 = vpack.c.bf16 %v1915_v1, %v1914_v11  ;;  %v1916_v21 = vld [vmem:[#allocation8 + $0x70] sm:$0xff] }
 0x9fc   :  { %v1788_v53 = vadd.f32 %v2558_v0, %v4342_v24  ;;  %v2559_v54 = vpop.f32.mrb[112].mxu1  ;;  %v1917_v0 = vld [vmem:[#allocation8 + $0x78] sm:$0xff] }
 0x9fd   :  { %v2560_v32 = vpop.f32.mrb[113].mxu1 }
 0x9fe   :  { %v3297_v35 = vpack.c.bf16 %v1788_v53, %v1783_v20  ;;  %v2561_v44 = vadd.f32 %v2560_v32, %v2559_v54  ;;  %v3333_v20 = vpack.c.bf16 %v1917_v0, %v1916_v21  ;;  %v2022_v32 = vld [vmem:[%s4401_s6] ss:$0 sm:$0xff] }
 0xa00   :  { %v2562_v57 = vpop.f32.mrb[114].mxu1  ;;  %3298 = vmatpush3.bf16.msra.mxu0 %v3297_v35  ;;  %v1793_v41 = vadd.f32 %v2561_v44, %v4342_v24 }
 0xa01   :  { %v2563_v60 = vpop.f32.mrb[115].mxu1  ;;  %3299 = vmatprep.subr.bf16.mxu0 %v3485_v3 }
 0xa02   :  { %v2564_v49 = vadd.f32 %v2563_v60, %v2562_v57 }
 0xa04   :  { %v1798_v7 = vadd.f32 %v2564_v49, %v4342_v24  ;;  %v2565_v43 = vpop.f32.mrb[116].mxu1 }
 0xa05   :  { %v2566_v55 = vpop.f32.mrb[117].mxu1 }
 0xa06   :  { %v3300_v5 = vpack.c.bf16 %v1798_v7, %v1793_v41  ;;  %v2567_v17 = vadd.f32 %v2566_v55, %v2565_v43 }
 0xa08   :  { %v2568_v26 = vpop.f32.mrb[118].mxu1  ;;  %3301 = vmatpush3.bf16.msra.mxu0 %v3300_v5  ;;  %v1803_v33 = vadd.f32 %v2567_v17, %v4342_v24 }
 0xa09   :  { %v2569_v4 = vpop.f32.mrb[119].mxu1  ;;  %3302 = vmatprep.subr.bf16.mxu0 %v3485_v3 }
 0xa0a   :  { %v2570_v31 = vadd.f32 %v2569_v4, %v2568_v26 }
 0xa0c   :  { %v1808_v9 = vadd.f32 %v2570_v31, %v4342_v24  ;;  %v2571_v12 = vpop.f32.mrb[120].mxu1 }
 0xa0d   :  { %v2572_v58 = vpop.f32.mrb[121].mxu1 }
 0xa0e   :  { %v3303_v13 = vpack.c.bf16 %v1808_v9, %v1803_v33  ;;  %v2573_v23 = vadd.f32 %v2572_v58, %v2571_v12 }
 0xa10   :  { %v2574_v30 = vpop.f32.mrb[122].mxu1  ;;  %3304 = vmatpush3.bf16.msra.mxu0 %v3303_v13  ;;  %v1813_v40 = vadd.f32 %v2573_v23, %v4342_v24 }
 0xa11   :  { %v2575_v38 = vpop.f32.mrb[123].mxu1  ;;  %3305 = vmatprep.subr.bf16.mxu0 %v3485_v3 }
 0xa12   :  { %v2576_v51 = vadd.f32 %v2575_v38, %v2574_v30 }
 0xa14   :  { %v1818_v10 = vadd.f32 %v2576_v51, %v4342_v24  ;;  %v2577_v16 = vpop.f32.mrb[124].mxu1 }
 0xa15   :  { %v2578_v8 = vpop.f32.mrb[125].mxu1 }
 0xa16   :  { %v3306_v52 = vpack.c.bf16 %v1818_v10, %v1813_v40  ;;  %v2579_v27 = vadd.f32 %v2578_v8, %v2577_v16 }
 0xa18   :  { %v2580_v19 = vpop.f32.mrb[126].mxu1  ;;  %3307 = vmatpush3.bf16.msra.mxu0 %v3306_v52  ;;  %v1823_v25 = vadd.f32 %v2579_v27, %v4342_v24 }
 0xa19   :  { %v2581_v50 = vpop.f32.mrb[127].mxu1  ;;  %3308 = vmatprep.subr.bf16.mxu0 %v3485_v3 }
 0xa1a   :  { %v2582_v15 = vadd.f32 %v2581_v50, %v2580_v19 }
 0xa1c   :  { %v1828_v48 = vadd.f32 %v2582_v15, %v4342_v24  ;;  %v1906_v24 = vld [vmem:[#allocation8 + $0x20] sm:$0xff] }
 0xa1d   :  { %v3318_v45 = vpack.c.bf16 %v1907_v59, %v1906_v24 }
 0xa1e   :  { %v3309_v39 = vpack.c.bf16 %v1828_v48, %v1823_v25 }
 0xa20   :  { %3310 = vmatpush3.bf16.msra.mxu0 %v3309_v39 }
 0xa21   :  { %3311 = vmatprep.subr.bf16.mxu0 %v3485_v3 }
 0xa23   :  { %2930 = vmatmul.mubr.f32.vlgmr.msra.gmra.mrb[112].mxu0 %v1831_v14 }
 0xa24   :  { %3313 = vmatpush3.bf16.msra.mxu0 %v3312_v62  ;;  %2964 = vmatprep.mubr.msk.f32.mxu0 %vm3486_vm0, %v3487_v6  ;;  %v1912_v6 = vld [vmem:[#allocation8 + $0x50] sm:$0xff] }
 0xa25   :  { %3314 = vmatprep.subr.bf16.mxu0 %v3485_v3  ;;  %v3327_v2 = vpack.c.bf16 %v1913_v22, %v1912_v6 }
 0xa28   :  { %3316 = vmatpush3.bf16.msra.mxu0 %v3315_v63 }
 0xa29   :  { %3317 = vmatprep.subr.bf16.mxu0 %v3485_v3 }
 0xa2c   :  { %3319 = vmatpush3.bf16.msra.mxu0 %v3318_v45 }
 0xa2d   :  { %3320 = vmatprep.subr.bf16.mxu0 %v3485_v3 }
 0xa30   :  { %3322 = vmatpush3.bf16.msra.mxu0 %v3321_v34 }
 0xa31   :  { %3323 = vmatprep.subr.bf16.mxu0 %v3485_v3 }
 0xa34   :  { %3325 = vmatpush3.bf16.msra.mxu0 %v3324_v61 }
 0xa35   :  { %3326 = vmatprep.subr.bf16.mxu0 %v3485_v3 }
 0xa38   :  { %3328 = vmatpush3.bf16.msra.mxu0 %v3327_v2 }
 0xa39   :  { %3329 = vmatprep.subr.bf16.mxu0 %v3485_v3 }
 0xa3c   :  { %3331 = vmatpush3.bf16.msra.mxu0 %v3330_v29 }
 0xa3d   :  { %3332 = vmatprep.subr.bf16.mxu0 %v3485_v3 }
 0xa40   :  { %3334 = vmatpush3.bf16.msra.mxu0 %v3333_v20 }
 0xaf6   :  { %v1898_v53 = vpop.f32.mrb[112].mxu0 }
 0xaf7   :  { %v2931_v54 = vpop.f32.mrb[113].mxu0  ;;  %2965 = vmatmul.mubr.f32.vlgmr.msra.gmra.mrb[114].mxu0 %v1898_v53 }
 0xbca   :  { %v1991_v35 = vpop.f32.mrb[114].mxu0 }
 0xbcb   :  { %v1992_v44 = vadd.f32 %v2022_v32, %v1991_v35  ;;  %v2966_v57 = vpop.f32.mrb[115].mxu0 }
 0xbcd   :  { %1995 = vst [vmem:[#allocation10] sm:$0xff] %v1992_v44 }
 0xbce   :  { %3460 = shalt.err (!%p3457_p8)
}
 0xbcf   :  { %s3461_s18 = scalar_lea.hbm %s4402_s7, 128 }
 0xbd0   :  { %p3462_p9 = scmp.ne.s32.totalorder %s4402_s7, %s3461_s18  ;;  %p3465_p10 = scmp.lt.u32.totalorder %s3461_s18, %s4402_s7 }
 0xbd2   :  { %p3467_p11 = pnand %p3465_p10, %p3462_p9 }
 0xbd4   :  { %3470 = shalt.err (!%p3467_p11)
}
 0xbd5   :  { %2005 = dma.vmem_to_hbm [thread:$0]  %s2003_s16, 128, %s4402_s7, [#allocation4]  }
 0xbd6   :  { %3477 = dma.done.wait [#allocation4], 128  }
 0xbd7   :  { %3478 = vsyncadd [#allocation4], 4294967168 }
 0xbd8   :  { %2009 = vsyncpa [#allocation3], 1 }
 0xbd9   :  { %2010 = vsyncpa [#allocation6], 1 }
 0xbda   :  { %2011 = vsyncpa [#allocation9], 1 }
 0xbdb   :  { %2012 = vsyncpa [#allocation4], 1 }

</bundles_post_ra>
